<compile_context>
chip_gen: v7x
topology: tpu7x:2x2x1
jax: 0.10.0
libtpu: 0.0.40
codegen_flags: <defaults>
</compile_context>

<pallas_src>
from functools import partial

import numpy as np

import jax
import jax.numpy as jnp
from jax import lax
from jax.experimental import pallas as pl
from jax.experimental.pallas import tpu as pltpu

NEG_SLOPE = 0.2   # LeakyReLU negative slope used in TemplateSelfLayer
BN_EPS = 1e-5     # nn.BatchNorm1d default eps


# ----------------------------- fused kernel -----------------------------------

def _point_decoder_kernel(x_ref, wqkv_ref, bqkv_ref, wo_ref, bvec_ref,
                          wlin_ref, w3_ref, b3_ref, out_ref, *, nhead):
    """Entire PointDecoder forward for ONE batch element (grid=(B,), "parallel").

    x_ref:    (1, S, D)   this cloud's activations (f32 residual stream).
    wqkv_ref: (L, D, 3*D) fused q/k/v weights, bf16; cols = [q | k | v], head-major inside each.
    bqkv_ref: (L, 1, 3*D) fused q/k/v biases, f32 (q part pre-scaled by 1/sqrt(dh)).
    wo_ref:   (L, D, D)   out-projection weights (x @ W form), bf16.
    bvec_ref: (L, 2, D)   row 0 = out-proj bias, row 1 = folded BatchNorm bias (f32).
    wlin_ref: (L, D, D)   Conv1d(D,D,1) weight with eval-BatchNorm scale folded in, bf16.
    w3_ref:   (D, 128)    Conv1d(D,3,1) weight, lane-padded with zeros, bf16.
    b3_ref:   (1, 128)    Conv1d(D,3,1) bias, lane-padded with zeros, f32.
    out_ref:  (1, S, 128) lane-dense output slab (real channels are [..., :3]).
    """
    f32, bf16 = jnp.float32, jnp.bfloat16
    nlayers, D, _ = wqkv_ref.shape
    dh = D // nhead

    x = x_ref[0]                                       # (S, D) f32 residual stream

    for l in range(nlayers):                           # static unroll over layers
        wqkv = wqkv_ref[l]                             # (D, 3D) bf16
        bqkv = bqkv_ref[l]                             # (1, 3D) f32
        wo = wo_ref[l]                                 # (D, D)  bf16
        wlin = wlin_ref[l]                             # (D, D)  bf16 (BN folded)
        bvec = bvec_ref[l]                             # (2, D)  f32
        bo, bbn = bvec[0:1, :], bvec[1:2, :]

        # ---- fused Q/K/V projection: ONE (S,D)@(D,3D) MXU matmul --------------------
        qkv = jnp.dot(x.astype(bf16), wqkv, preferred_element_type=f32) + bqkv
        qkv16 = qkv.astype(bf16)                       # single cast for all MXU operands

        # ---- per-head attention (QK^T / PV are inherently dh-deep; softmax in f32) ---
        o_heads = []
        for h in range(nhead):
            q = qkv16[:, h * dh:(h + 1) * dh]          # 1/sqrt(dh) already folded in
            k = qkv16[:, D + h * dh:D + (h + 1) * dh]
            v = qkv16[:, 2 * D + h * dh:2 * D + (h + 1) * dh]

            s = jnp.einsum('qe,ke->qk', q, k, preferred_element_type=f32)   # (S, S)
            s = s - jnp.max(s, axis=-1, keepdims=True)
            p = jnp.exp(s)
            denom = jnp.sum(p, axis=-1, keepdims=True)                      # >= 1 (no mask)
            inv = pl.reciprocal(denom, approx=True)                         # EUP estimate
            inv = inv * (2.0 - denom * inv)                                 # Newton -> ~f32
            o_heads.append(
                jnp.dot(p.astype(bf16), v, preferred_element_type=f32) * inv)  # (S, dh)
        o_cat = jnp.concatenate(o_heads, axis=-1)      # (S, D) head-major (PyTorch order)

        # ---- out-projection as ONE (S,D)@(D,D) matmul --------------------------------
        src2 = jnp.dot(o_cat.astype(bf16), wo, preferred_element_type=f32) + bo

        # ---- src - dropout(src2); Conv1d(D,D,1)+BN(eval) folded; LeakyReLU; residual --
        y = x - src2                                   # dropout = identity in eval mode
        z = jnp.dot(y.astype(bf16), wlin, preferred_element_type=f32) + bbn
        z = jnp.where(z >= 0.0, z, NEG_SLOPE * z)
        x = x + z                                      # PointDecoder outer residual

    # ---- final Conv1d(D, 3, 1, bias=True), lane-padded to 128 output channels --------
    out = jnp.dot(x.astype(bf16), w3_ref[...], preferred_element_type=f32) + b3_ref[...]
    out_ref[0] = out.astype(out_ref.dtype)


# ----------------------------- wrapper -----------------------------------------

@partial(jax.jit, static_argnames=("nhead",))
def point_decoder_forward(src_sbd, prep, *, nhead):
    """src_sbd: (S, B, D) exactly like the PyTorch module.  Returns (B, S, 3)."""
    S, B, D = src_sbd.shape
    out_pad = prep['w3'].shape[1]

    # Batch-major layout so each grid step owns one cloud's rows: no cross-batch mask,
    # no wasted cross-batch score FLOPs, and v7x's 2 TensorCores split the batch.
    x_bsd = jnp.transpose(src_sbd, (1, 0, 2))          # (B, S, D) — one cheap layout pass

    weights = (prep['wqkv'], prep['bqkv'], prep['wo'], prep['bvec'],
               prep['wlin'], prep['w3'], prep['b3'])

    def whole(arr):                                    # whole-array block, same for every step
        n = arr.ndim
        return pl.BlockSpec(arr.shape, lambda b, _n=n: (0,) * _n)

    out = pl.pallas_call(
        partial(_point_decoder_kernel, nhead=nhead),
        out_shape=jax.ShapeDtypeStruct((B, S, out_pad), src_sbd.dtype),
        grid=(B,),
        in_specs=[pl.BlockSpec((1, S, D), lambda b: (b, 0, 0))] + [whole(w) for w in weights],
        out_specs=pl.BlockSpec((1, S, out_pad), lambda b: (b, 0, 0)),
        compiler_params=pltpu.CompilerParams(dimension_semantics=("parallel",)),
    )(x_bsd, *weights)

    # Only the tiny 3-channel result is sliced out of the lane-dense slab.
    return out[:, :, :3]                               # (B, S, 3)


# ----------------------------- one-time weight preparation ---------------------

def prepare_params(layer_params, mlp_params, nhead, out_pad=128, mxu_dtype=jnp.bfloat16):
    """Host-side prep done once: transpose to x@W form, fold BN + q-scale, fuse QKV, stack."""
    D = layer_params[0]['wq'].shape[0]
    dh = D // nhead
    scale = 1.0 / float(np.sqrt(dh))

    wqkv_l, bqkv_l, wo_l, wlin_l, bvec_l = [], [], [], [], []
    for p in layer_params:
        # torch stores (D_out, D_in); x @ W.T keeps output columns head-major (head h =
        # cols h*dh:(h+1)*dh), matching nn.MultiheadAttention's head split.
        wq = p['wq'].T * scale                          # fold 1/sqrt(dh) into q projection
        wk = p['wk'].T
        wv = p['wv'].T
        wqkv_l.append(jnp.concatenate([wq, wk, wv], axis=1))                      # (D, 3D)
        bqkv_l.append(jnp.concatenate([p['bq'] * scale, p['bk'], p['bv']])[None]) # (1, 3D)

        wo_l.append(p['wo'].T)                                                    # (D, D)

        a = p['gamma'] * lax.rsqrt(p['rvar'] + BN_EPS)                            # BN eval scale
        wlin_l.append(p['wlin'].T * a[None, :])                                   # fold BN in W
        bvec_l.append(jnp.stack([p['bo'], p['beta'] - p['rmean'] * a], 0))        # (2, D)

    w3, b3 = mlp_params                                                           # Conv1d(D,3,1)
    w3p = jnp.zeros((D, out_pad), jnp.float32).at[:, :3].set(w3.T)                # lane-dense
    b3p = jnp.zeros((1, out_pad), jnp.float32).at[:, :3].set(b3)

    # Matmul weight stacks in bf16 (MXU-native on v5e/v6e/v7x, half the DMA); biases f32.
    return dict(
        wqkv=jnp.stack(wqkv_l).astype(mxu_dtype),
        bqkv=jnp.stack(bqkv_l).astype(jnp.float32),
        wo=jnp.stack(wo_l).astype(mxu_dtype),
        wlin=jnp.stack(wlin_l).astype(mxu_dtype),
        bvec=jnp.stack(bvec_l).astype(jnp.float32),
        w3=w3p.astype(mxu_dtype),
        b3=b3p.astype(jnp.float32),
    )


# ----------------------------- pure-JAX reference ------------------------------

def _reference_forward(src_sbd, layer_params, mlp_params, nhead):
    x = jnp.transpose(src_sbd, (1, 0, 2))
    B, S, D = x.shape
    dh = D // nhead
    for p in layer_params:
        q = x @ p['wq'].T + p['bq']
        k = x @ p['wk'].T + p['bk']
        v = x @ p['wv'].T + p['bv']
        qh = q.reshape(B, S, nhead, dh).transpose(0, 2, 1, 3)
        kh = k.reshape(B, S, nhead, dh).transpose(0, 2, 1, 3)
        vh = v.reshape(B, S, nhead, dh).transpose(0, 2, 1, 3)
        s = jnp.einsum('bhqd,bhkd->bhqk', qh, kh) / jnp.sqrt(jnp.float32(dh))
        a = jax.nn.softmax(s, axis=-1)
        oh = jnp.einsum('bhqk,bhkd->bhqd', a, vh)
        attn = oh.transpose(0, 2, 1, 3).reshape(B, S, D)
        src2 = attn @ p['wo'].T + p['bo']
        y = x - src2
        z = y @ p['wlin'].T
        z = (z - p['rmean']) * lax.rsqrt(p['rvar'] + BN_EPS) * p['gamma'] + p['beta']
        z = jnp.where(z >= 0, z, NEG_SLOPE * z)
        x = x + z
    w3, b3 = mlp_params
    return x @ w3.T + b3


# ----------------------------- parameter init ----------------------------------

def init_layer_params(key, D):
    ks = jax.random.split(key, 13)
    std = 1.0 / np.sqrt(D)
    f32 = jnp.float32
    return dict(
        wq=jax.random.normal(ks[0], (D, D), f32) * std,
        wk=jax.random.normal(ks[1], (D, D), f32) * std,
        wv=jax.random.normal(ks[2], (D, D), f32) * std,
        bq=jax.random.normal(ks[3], (D,), f32) * 0.01,
        bk=jax.random.normal(ks[4], (D,), f32) * 0.01,
        bv=jax.random.normal(ks[5], (D,), f32) * 0.01,
        wo=jax.random.normal(ks[6], (D, D), f32) * std,
        bo=jax.random.normal(ks[7], (D,), f32) * 0.01,
        wlin=jax.random.normal(ks[8], (D, D), f32) * std,          # Conv1d(D,D,1,bias=False)
        gamma=1.0 + 0.1 * jax.random.normal(ks[9], (D,), f32),     # BatchNorm1d weight
        beta=0.1 * jax.random.normal(ks[10], (D,), f32),           # BatchNorm1d bias
        rmean=0.1 * jax.random.normal(ks[11], (D,), f32),          # running_mean (eval)
        rvar=1.0 + 0.1 * jax.random.uniform(ks[12], (D,), f32),    # running_var (eval, > 0)
    )


# ----------------------------- main ---------------------------------------------

if __name__ == "__main__":
    # hparams implied by the module: d_feedforward (= d_model of the layers), nhead.
    S, B, D = 8, 2, 32          # (seq, batch, d_feedforward)
    NHEAD = 4
    layer_list = ['s', 's']     # two TemplateSelfLayers

    key = jax.random.PRNGKey(0)
    k_src, k_params, k_mlp, k_b3 = jax.random.split(key, 4)

    src = jax.random.normal(k_src, (S, B, D), jnp.float32)          # PyTorch layout (S, B, D)

    layer_params = [init_layer_params(jax.random.fold_in(k_params, i), D)
                    for i in range(len(layer_list))]
    w3 = jax.random.normal(k_mlp, (3, D), jnp.float32) * (1.0 / np.sqrt(D))  # Conv1d(D,3,1) w
    b3 = jax.random.normal(k_b3, (3,), jnp.float32) * 0.1                    # Conv1d(D,3,1) b
    mlp_params = (w3, b3)

    prep = prepare_params(layer_params, mlp_params, NHEAD)          # one-time host-side prep

    out = jax.block_until_ready(point_decoder_forward(src, prep, nhead=NHEAD))   # (B, S, 3)
    ref = jax.block_until_ready(_reference_forward(src, layer_params, mlp_params, NHEAD))

    assert out.shape == (B, S, 3), out.shape
    # Tolerance covers bf16 MXU operands (f32 accumulation) through two residual layers plus
    # the EUP approx-reciprocal (+ Newton) softmax path vs. the pure-f32 reference; worst-element
    # error is ~1-3e-2 here, while genuine bugs produce O(0.1+) errors.
    np.testing.assert_allclose(np.asarray(out), np.asarray(ref), rtol=1e-2, atol=4e-2)

    print("KERNEL_OK")
</pallas_src>

<mosaic_0001>
module attributes {stable_mosaic.version = 11 : i64} {
  func.func @_point_decoder_kernel(%arg0: i32, %arg1: memref<1x8x32xf32, #tpu.memory_space<vmem>>, %arg2: memref<2x32x96xbf16, #tpu.memory_space<vmem>>, %arg3: memref<2x1x96xf32, #tpu.memory_space<vmem>>, %arg4: memref<2x32x32xbf16, #tpu.memory_space<vmem>>, %arg5: memref<2x2x32xf32, #tpu.memory_space<vmem>>, %arg6: memref<2x32x32xbf16, #tpu.memory_space<vmem>>, %arg7: memref<32x128xbf16, #tpu.memory_space<vmem>>, %arg8: memref<1x128xf32, #tpu.memory_space<vmem>>, %arg9: memref<1x8x128xf32, #tpu.memory_space<vmem>>) attributes {dimension_semantics = [#tpu.dimension_semantics<parallel>], iteration_bounds = array<i64: 2>, scalar_prefetch = 0 : i64, scratch_operands = 0 : i64, tpu.core_type = #tpu.core_type<tc>, window_params = [{transform_indices = @transform_0, window_bounds = array<i64: 1, 8, 32>}, {pipeline_mode = #tpu.pipeline_mode<synchronous>, transform_indices = @transform_1, window_bounds = array<i64: 2, 32, 96>}, {pipeline_mode = #tpu.pipeline_mode<synchronous>, transform_indices = @transform_2, window_bounds = array<i64: 2, 1, 96>}, {pipeline_mode = #tpu.pipeline_mode<synchronous>, transform_indices = @transform_3, window_bounds = array<i64: 2, 32, 32>}, {pipeline_mode = #tpu.pipeline_mode<synchronous>, transform_indices = @transform_4, window_bounds = array<i64: 2, 2, 32>}, {pipeline_mode = #tpu.pipeline_mode<synchronous>, transform_indices = @transform_5, window_bounds = array<i64: 2, 32, 32>}, {pipeline_mode = #tpu.pipeline_mode<synchronous>, transform_indices = @transform_6, window_bounds = array<i64: 32, 128>}, {pipeline_mode = #tpu.pipeline_mode<synchronous>, transform_indices = @transform_7, window_bounds = array<i64: 1, 128>}, {transform_indices = @transform_8, window_bounds = array<i64: 1, 8, 128>}]} {
    %c0 = arith.constant 0 : index
    %c0_0 = arith.constant 0 : index
    %c0_1 = arith.constant 0 : index
    %0 = vector.load %arg1[%c0, %c0_0, %c0_1] : memref<1x8x32xf32, #tpu.memory_space<vmem>>, vector<1x8x32xf32>
    %1 = vector.shape_cast %0 : vector<1x8x32xf32> to vector<8x32xf32>
    %c0_2 = arith.constant 0 : index
    %c0_3 = arith.constant 0 : index
    %c0_4 = arith.constant 0 : index
    %2 = vector.load %arg2[%c0_2, %c0_3, %c0_4] : memref<2x32x96xbf16, #tpu.memory_space<vmem>>, vector<1x32x96xbf16>
    %3 = vector.shape_cast %2 : vector<1x32x96xbf16> to vector<32x96xbf16>
    %c0_5 = arith.constant 0 : index
    %c0_6 = arith.constant 0 : index
    %c0_7 = arith.constant 0 : index
    %4 = vector.load %arg3[%c0_5, %c0_6, %c0_7] : memref<2x1x96xf32, #tpu.memory_space<vmem>>, vector<1x1x96xf32>
    %5 = vector.shape_cast %4 : vector<1x1x96xf32> to vector<1x96xf32>
    %c0_8 = arith.constant 0 : index
    %c0_9 = arith.constant 0 : index
    %c0_10 = arith.constant 0 : index
    %6 = vector.load %arg4[%c0_8, %c0_9, %c0_10] : memref<2x32x32xbf16, #tpu.memory_space<vmem>>, vector<1x32x32xbf16>
    %7 = vector.shape_cast %6 : vector<1x32x32xbf16> to vector<32x32xbf16>
    %c0_11 = arith.constant 0 : index
    %c0_12 = arith.constant 0 : index
    %c0_13 = arith.constant 0 : index
    %8 = vector.load %arg6[%c0_11, %c0_12, %c0_13] : memref<2x32x32xbf16, #tpu.memory_space<vmem>>, vector<1x32x32xbf16>
    %9 = vector.shape_cast %8 : vector<1x32x32xbf16> to vector<32x32xbf16>
    %c0_14 = arith.constant 0 : index
    %c0_15 = arith.constant 0 : index
    %c0_16 = arith.constant 0 : index
    %10 = vector.load %arg5[%c0_14, %c0_15, %c0_16] : memref<2x2x32xf32, #tpu.memory_space<vmem>>, vector<1x2x32xf32>
    %11 = vector.shape_cast %10 : vector<1x2x32xf32> to vector<2x32xf32>
    %12 = vector.extract_strided_slice %11 {offsets = [0, 0], sizes = [1, 32], strides = [1, 1]} : vector<2x32xf32> to vector<1x32xf32>
    %13 = vector.extract_strided_slice %11 {offsets = [1, 0], sizes = [1, 32], strides = [1, 1]} : vector<2x32xf32> to vector<1x32xf32>
    %14 = arith.truncf %1 : vector<8x32xf32> to vector<8x32xbf16>
    %cst = arith.constant dense<0.000000e+00> : vector<8x96xf32>
    %15 = tpu.matmul %14, %3, %cst {dimension_numbers = #tpu.dot_dimension_numbers<[1], [0], [0], [1], [0, 0, 1, 1], [], []>} : vector<8x32xbf16>, vector<32x96xbf16>, vector<8x96xf32> -> vector<8x96xf32>
    %16 = vector.broadcast %5 : vector<1x96xf32> to vector<8x96xf32>
    %17 = arith.addf %15, %16 : vector<8x96xf32>
    %18 = arith.truncf %17 : vector<8x96xf32> to vector<8x96xbf16>
    %19 = vector.extract_strided_slice %18 {offsets = [0, 0], sizes = [8, 8], strides = [1, 1]} : vector<8x96xbf16> to vector<8x8xbf16>
    %20 = vector.extract_strided_slice %18 {offsets = [0, 32], sizes = [8, 8], strides = [1, 1]} : vector<8x96xbf16> to vector<8x8xbf16>
    %21 = vector.extract_strided_slice %18 {offsets = [0, 64], sizes = [8, 8], strides = [1, 1]} : vector<8x96xbf16> to vector<8x8xbf16>
    "tpu.trace_start"() <{level = 10 : i32, message = "qe,ke->qk"}> : () -> ()
    %cst_17 = arith.constant dense<0.000000e+00> : vector<8x8xf32>
    %22 = tpu.matmul %19, %20, %cst_17 {dimension_numbers = #tpu.dot_dimension_numbers<[1], [1], [0], [0], [0, 0, 1, 0], [], []>} : vector<8x8xbf16>, vector<8x8xbf16>, vector<8x8xf32> -> vector<8x8xf32>
    "tpu.trace_stop"() : () -> ()
    %cst_18 = arith.constant dense<0xFF800000> : vector<8xf32>
    %23 = vector.multi_reduction <maximumf>, %22, %cst_18 [1] : vector<8x8xf32> to vector<8xf32>
    %24 = vector.shape_cast %23 : vector<8xf32> to vector<8x1xf32>
    %25 = vector.broadcast %24 : vector<8x1xf32> to vector<8x8xf32>
    %26 = arith.subf %22, %25 : vector<8x8xf32>
    %27 = math.exp %26 : vector<8x8xf32>
    %cst_19 = arith.constant dense<0.000000e+00> : vector<8xf32>
    %28 = vector.multi_reduction <add>, %27, %cst_19 [1] : vector<8x8xf32> to vector<8xf32>
    %29 = vector.shape_cast %28 : vector<8xf32> to vector<8x1xf32>
    %30 = tpu.reciprocal %29 {approx = true} : vector<8x1xf32> -> vector<8x1xf32>
    %31 = arith.mulf %29, %30 : vector<8x1xf32>
    %cst_20 = arith.constant 2.000000e+00 : f32
    %32 = vector.broadcast %cst_20 : f32 to vector<8x1xf32>
    %33 = arith.subf %32, %31 : vector<8x1xf32>
    %34 = arith.mulf %30, %33 : vector<8x1xf32>
    %35 = arith.truncf %27 : vector<8x8xf32> to vector<8x8xbf16>
    %cst_21 = arith.constant dense<0.000000e+00> : vector<8x8xf32>
    %36 = tpu.matmul %35, %21, %cst_21 {dimension_numbers = #tpu.dot_dimension_numbers<[1], [0], [0], [1], [0, 0, 1, 1], [], []>} : vector<8x8xbf16>, vector<8x8xbf16>, vector<8x8xf32> -> vector<8x8xf32>
    %37 = vector.broadcast %34 : vector<8x1xf32> to vector<8x8xf32>
    %38 = arith.mulf %36, %37 : vector<8x8xf32>
    %39 = vector.extract_strided_slice %18 {offsets = [0, 8], sizes = [8, 8], strides = [1, 1]} : vector<8x96xbf16> to vector<8x8xbf16>
    %40 = vector.extract_strided_slice %18 {offsets = [0, 40], sizes = [8, 8], strides = [1, 1]} : vector<8x96xbf16> to vector<8x8xbf16>
    %41 = vector.extract_strided_slice %18 {offsets = [0, 72], sizes = [8, 8], strides = [1, 1]} : vector<8x96xbf16> to vector<8x8xbf16>
    "tpu.trace_start"() <{level = 10 : i32, message = "qe,ke->qk"}> : () -> ()
    %cst_22 = arith.constant dense<0.000000e+00> : vector<8x8xf32>
    %42 = tpu.matmul %39, %40, %cst_22 {dimension_numbers = #tpu.dot_dimension_numbers<[1], [1], [0], [0], [0, 0, 1, 0], [], []>} : vector<8x8xbf16>, vector<8x8xbf16>, vector<8x8xf32> -> vector<8x8xf32>
    "tpu.trace_stop"() : () -> ()
    %cst_23 = arith.constant dense<0xFF800000> : vector<8xf32>
    %43 = vector.multi_reduction <maximumf>, %42, %cst_23 [1] : vector<8x8xf32> to vector<8xf32>
    %44 = vector.shape_cast %43 : vector<8xf32> to vector<8x1xf32>
    %45 = vector.broadcast %44 : vector<8x1xf32> to vector<8x8xf32>
    %46 = arith.subf %42, %45 : vector<8x8xf32>
    %47 = math.exp %46 : vector<8x8xf32>
    %cst_24 = arith.constant dense<0.000000e+00> : vector<8xf32>
    %48 = vector.multi_reduction <add>, %47, %cst_24 [1] : vector<8x8xf32> to vector<8xf32>
    %49 = vector.shape_cast %48 : vector<8xf32> to vector<8x1xf32>
    %50 = tpu.reciprocal %49 {approx = true} : vector<8x1xf32> -> vector<8x1xf32>
    %51 = arith.mulf %49, %50 : vector<8x1xf32>
    %cst_25 = arith.constant 2.000000e+00 : f32
    %52 = vector.broadcast %cst_25 : f32 to vector<8x1xf32>
    %53 = arith.subf %52, %51 : vector<8x1xf32>
    %54 = arith.mulf %50, %53 : vector<8x1xf32>
    %55 = arith.truncf %47 : vector<8x8xf32> to vector<8x8xbf16>
    %cst_26 = arith.constant dense<0.000000e+00> : vector<8x8xf32>
    %56 = tpu.matmul %55, %41, %cst_26 {dimension_numbers = #tpu.dot_dimension_numbers<[1], [0], [0], [1], [0, 0, 1, 1], [], []>} : vector<8x8xbf16>, vector<8x8xbf16>, vector<8x8xf32> -> vector<8x8xf32>
    %57 = vector.broadcast %54 : vector<8x1xf32> to vector<8x8xf32>
    %58 = arith.mulf %56, %57 : vector<8x8xf32>
    %59 = vector.extract_strided_slice %18 {offsets = [0, 16], sizes = [8, 8], strides = [1, 1]} : vector<8x96xbf16> to vector<8x8xbf16>
    %60 = vector.extract_strided_slice %18 {offsets = [0, 48], sizes = [8, 8], strides = [1, 1]} : vector<8x96xbf16> to vector<8x8xbf16>
    %61 = vector.extract_strided_slice %18 {offsets = [0, 80], sizes = [8, 8], strides = [1, 1]} : vector<8x96xbf16> to vector<8x8xbf16>
    "tpu.trace_start"() <{level = 10 : i32, message = "qe,ke->qk"}> : () -> ()
    %cst_27 = arith.constant dense<0.000000e+00> : vector<8x8xf32>
    %62 = tpu.matmul %59, %60, %cst_27 {dimension_numbers = #tpu.dot_dimension_numbers<[1], [1], [0], [0], [0, 0, 1, 0], [], []>} : vector<8x8xbf16>, vector<8x8xbf16>, vector<8x8xf32> -> vector<8x8xf32>
    "tpu.trace_stop"() : () -> ()
    %cst_28 = arith.constant dense<0xFF800000> : vector<8xf32>
    %63 = vector.multi_reduction <maximumf>, %62, %cst_28 [1] : vector<8x8xf32> to vector<8xf32>
    %64 = vector.shape_cast %63 : vector<8xf32> to vector<8x1xf32>
    %65 = vector.broadcast %64 : vector<8x1xf32> to vector<8x8xf32>
    %66 = arith.subf %62, %65 : vector<8x8xf32>
    %67 = math.exp %66 : vector<8x8xf32>
    %cst_29 = arith.constant dense<0.000000e+00> : vector<8xf32>
    %68 = vector.multi_reduction <add>, %67, %cst_29 [1] : vector<8x8xf32> to vector<8xf32>
    %69 = vector.shape_cast %68 : vector<8xf32> to vector<8x1xf32>
    %70 = tpu.reciprocal %69 {approx = true} : vector<8x1xf32> -> vector<8x1xf32>
    %71 = arith.mulf %69, %70 : vector<8x1xf32>
    %cst_30 = arith.constant 2.000000e+00 : f32
    %72 = vector.broadcast %cst_30 : f32 to vector<8x1xf32>
    %73 = arith.subf %72, %71 : vector<8x1xf32>
    %74 = arith.mulf %70, %73 : vector<8x1xf32>
    %75 = arith.truncf %67 : vector<8x8xf32> to vector<8x8xbf16>
    %cst_31 = arith.constant dense<0.000000e+00> : vector<8x8xf32>
    %76 = tpu.matmul %75, %61, %cst_31 {dimension_numbers = #tpu.dot_dimension_numbers<[1], [0], [0], [1], [0, 0, 1, 1], [], []>} : vector<8x8xbf16>, vector<8x8xbf16>, vector<8x8xf32> -> vector<8x8xf32>
    %77 = vector.broadcast %74 : vector<8x1xf32> to vector<8x8xf32>
    %78 = arith.mulf %76, %77 : vector<8x8xf32>
    %79 = vector.extract_strided_slice %18 {offsets = [0, 24], sizes = [8, 8], strides = [1, 1]} : vector<8x96xbf16> to vector<8x8xbf16>
    %80 = vector.extract_strided_slice %18 {offsets = [0, 56], sizes = [8, 8], strides = [1, 1]} : vector<8x96xbf16> to vector<8x8xbf16>
    %81 = vector.extract_strided_slice %18 {offsets = [0, 88], sizes = [8, 8], strides = [1, 1]} : vector<8x96xbf16> to vector<8x8xbf16>
    "tpu.trace_start"() <{level = 10 : i32, message = "qe,ke->qk"}> : () -> ()
    %cst_32 = arith.constant dense<0.000000e+00> : vector<8x8xf32>
    %82 = tpu.matmul %79, %80, %cst_32 {dimension_numbers = #tpu.dot_dimension_numbers<[1], [1], [0], [0], [0, 0, 1, 0], [], []>} : vector<8x8xbf16>, vector<8x8xbf16>, vector<8x8xf32> -> vector<8x8xf32>
    "tpu.trace_stop"() : () -> ()
    %cst_33 = arith.constant dense<0xFF800000> : vector<8xf32>
    %83 = vector.multi_reduction <maximumf>, %82, %cst_33 [1] : vector<8x8xf32> to vector<8xf32>
    %84 = vector.shape_cast %83 : vector<8xf32> to vector<8x1xf32>
    %85 = vector.broadcast %84 : vector<8x1xf32> to vector<8x8xf32>
    %86 = arith.subf %82, %85 : vector<8x8xf32>
    %87 = math.exp %86 : vector<8x8xf32>
    %cst_34 = arith.constant dense<0.000000e+00> : vector<8xf32>
    %88 = vector.multi_reduction <add>, %87, %cst_34 [1] : vector<8x8xf32> to vector<8xf32>
    %89 = vector.shape_cast %88 : vector<8xf32> to vector<8x1xf32>
    %90 = tpu.reciprocal %89 {approx = true} : vector<8x1xf32> -> vector<8x1xf32>
    %91 = arith.mulf %89, %90 : vector<8x1xf32>
    %cst_35 = arith.constant 2.000000e+00 : f32
    %92 = vector.broadcast %cst_35 : f32 to vector<8x1xf32>
    %93 = arith.subf %92, %91 : vector<8x1xf32>
    %94 = arith.mulf %90, %93 : vector<8x1xf32>
    %95 = arith.truncf %87 : vector<8x8xf32> to vector<8x8xbf16>
    %cst_36 = arith.constant dense<0.000000e+00> : vector<8x8xf32>
    %96 = tpu.matmul %95, %81, %cst_36 {dimension_numbers = #tpu.dot_dimension_numbers<[1], [0], [0], [1], [0, 0, 1, 1], [], []>} : vector<8x8xbf16>, vector<8x8xbf16>, vector<8x8xf32> -> vector<8x8xf32>
    %97 = vector.broadcast %94 : vector<8x1xf32> to vector<8x8xf32>
    %98 = arith.mulf %96, %97 : vector<8x8xf32>
    %99 = tpu.concatenate %38, %58, %78, %98 in 1 : vector<8x8xf32>, vector<8x8xf32>, vector<8x8xf32>, vector<8x8xf32> -> vector<8x32xf32>
    %100 = arith.truncf %99 : vector<8x32xf32> to vector<8x32xbf16>
    %cst_37 = arith.constant dense<0.000000e+00> : vector<8x32xf32>
    %101 = tpu.matmul %100, %7, %cst_37 {dimension_numbers = #tpu.dot_dimension_numbers<[1], [0], [0], [1], [0, 0, 1, 1], [], []>} : vector<8x32xbf16>, vector<32x32xbf16>, vector<8x32xf32> -> vector<8x32xf32>
    %102 = vector.broadcast %12 : vector<1x32xf32> to vector<8x32xf32>
    %103 = arith.addf %101, %102 : vector<8x32xf32>
    %104 = arith.subf %1, %103 : vector<8x32xf32>
    %105 = arith.truncf %104 : vector<8x32xf32> to vector<8x32xbf16>
    %cst_38 = arith.constant dense<0.000000e+00> : vector<8x32xf32>
    %106 = tpu.matmul %105, %9, %cst_38 {dimension_numbers = #tpu.dot_dimension_numbers<[1], [0], [0], [1], [0, 0, 1, 1], [], []>} : vector<8x32xbf16>, vector<32x32xbf16>, vector<8x32xf32> -> vector<8x32xf32>
    %107 = vector.broadcast %13 : vector<1x32xf32> to vector<8x32xf32>
    %108 = arith.addf %106, %107 : vector<8x32xf32>
    %cst_39 = arith.constant 0.000000e+00 : f32
    %109 = vector.broadcast %cst_39 : f32 to vector<8x32xf32>
    %110 = arith.cmpf oge, %108, %109 : vector<8x32xf32>
    %cst_40 = arith.constant 2.000000e-01 : f32
    %111 = vector.broadcast %cst_40 : f32 to vector<8x32xf32>
    %112 = arith.mulf %111, %108 : vector<8x32xf32>
    %113 = arith.select %110, %108, %112 : vector<8x32xi1>, vector<8x32xf32>
    %114 = arith.addf %1, %113 : vector<8x32xf32>
    %c1 = arith.constant 1 : index
    %c0_41 = arith.constant 0 : index
    %c0_42 = arith.constant 0 : index
    %115 = vector.load %arg2[%c1, %c0_41, %c0_42] : memref<2x32x96xbf16, #tpu.memory_space<vmem>>, vector<1x32x96xbf16>
    %116 = vector.shape_cast %115 : vector<1x32x96xbf16> to vector<32x96xbf16>
    %c1_43 = arith.constant 1 : index
    %c0_44 = arith.constant 0 : index
    %c0_45 = arith.constant 0 : index
    %117 = vector.load %arg3[%c1_43, %c0_44, %c0_45] : memref<2x1x96xf32, #tpu.memory_space<vmem>>, vector<1x1x96xf32>
    %118 = vector.shape_cast %117 : vector<1x1x96xf32> to vector<1x96xf32>
    %c1_46 = arith.constant 1 : index
    %c0_47 = arith.constant 0 : index
    %c0_48 = arith.constant 0 : index
    %119 = vector.load %arg4[%c1_46, %c0_47, %c0_48] : memref<2x32x32xbf16, #tpu.memory_space<vmem>>, vector<1x32x32xbf16>
    %120 = vector.shape_cast %119 : vector<1x32x32xbf16> to vector<32x32xbf16>
    %c1_49 = arith.constant 1 : index
    %c0_50 = arith.constant 0 : index
    %c0_51 = arith.constant 0 : index
    %121 = vector.load %arg6[%c1_49, %c0_50, %c0_51] : memref<2x32x32xbf16, #tpu.memory_space<vmem>>, vector<1x32x32xbf16>
    %122 = vector.shape_cast %121 : vector<1x32x32xbf16> to vector<32x32xbf16>
    %c1_52 = arith.constant 1 : index
    %c0_53 = arith.constant 0 : index
    %c0_54 = arith.constant 0 : index
    %123 = vector.load %arg5[%c1_52, %c0_53, %c0_54] : memref<2x2x32xf32, #tpu.memory_space<vmem>>, vector<1x2x32xf32>
    %124 = vector.shape_cast %123 : vector<1x2x32xf32> to vector<2x32xf32>
    %125 = vector.extract_strided_slice %124 {offsets = [0, 0], sizes = [1, 32], strides = [1, 1]} : vector<2x32xf32> to vector<1x32xf32>
    %126 = vector.extract_strided_slice %124 {offsets = [1, 0], sizes = [1, 32], strides = [1, 1]} : vector<2x32xf32> to vector<1x32xf32>
    %127 = arith.truncf %114 : vector<8x32xf32> to vector<8x32xbf16>
    %cst_55 = arith.constant dense<0.000000e+00> : vector<8x96xf32>
    %128 = tpu.matmul %127, %116, %cst_55 {dimension_numbers = #tpu.dot_dimension_numbers<[1], [0], [0], [1], [0, 0, 1, 1], [], []>} : vector<8x32xbf16>, vector<32x96xbf16>, vector<8x96xf32> -> vector<8x96xf32>
    %129 = vector.broadcast %118 : vector<1x96xf32> to vector<8x96xf32>
    %130 = arith.addf %128, %129 : vector<8x96xf32>
    %131 = arith.truncf %130 : vector<8x96xf32> to vector<8x96xbf16>
    %132 = vector.extract_strided_slice %131 {offsets = [0, 0], sizes = [8, 8], strides = [1, 1]} : vector<8x96xbf16> to vector<8x8xbf16>
    %133 = vector.extract_strided_slice %131 {offsets = [0, 32], sizes = [8, 8], strides = [1, 1]} : vector<8x96xbf16> to vector<8x8xbf16>
    %134 = vector.extract_strided_slice %131 {offsets = [0, 64], sizes = [8, 8], strides = [1, 1]} : vector<8x96xbf16> to vector<8x8xbf16>
    "tpu.trace_start"() <{level = 10 : i32, message = "qe,ke->qk"}> : () -> ()
    %cst_56 = arith.constant dense<0.000000e+00> : vector<8x8xf32>
    %135 = tpu.matmul %132, %133, %cst_56 {dimension_numbers = #tpu.dot_dimension_numbers<[1], [1], [0], [0], [0, 0, 1, 0], [], []>} : vector<8x8xbf16>, vector<8x8xbf16>, vector<8x8xf32> -> vector<8x8xf32>
    "tpu.trace_stop"() : () -> ()
    %cst_57 = arith.constant dense<0xFF800000> : vector<8xf32>
    %136 = vector.multi_reduction <maximumf>, %135, %cst_57 [1] : vector<8x8xf32> to vector<8xf32>
    %137 = vector.shape_cast %136 : vector<8xf32> to vector<8x1xf32>
    %138 = vector.broadcast %137 : vector<8x1xf32> to vector<8x8xf32>
    %139 = arith.subf %135, %138 : vector<8x8xf32>
    %140 = math.exp %139 : vector<8x8xf32>
    %cst_58 = arith.constant dense<0.000000e+00> : vector<8xf32>
    %141 = vector.multi_reduction <add>, %140, %cst_58 [1] : vector<8x8xf32> to vector<8xf32>
    %142 = vector.shape_cast %141 : vector<8xf32> to vector<8x1xf32>
    %143 = tpu.reciprocal %142 {approx = true} : vector<8x1xf32> -> vector<8x1xf32>
    %144 = arith.mulf %142, %143 : vector<8x1xf32>
    %cst_59 = arith.constant 2.000000e+00 : f32
    %145 = vector.broadcast %cst_59 : f32 to vector<8x1xf32>
    %146 = arith.subf %145, %144 : vector<8x1xf32>
    %147 = arith.mulf %143, %146 : vector<8x1xf32>
    %148 = arith.truncf %140 : vector<8x8xf32> to vector<8x8xbf16>
    %cst_60 = arith.constant dense<0.000000e+00> : vector<8x8xf32>
    %149 = tpu.matmul %148, %134, %cst_60 {dimension_numbers = #tpu.dot_dimension_numbers<[1], [0], [0], [1], [0, 0, 1, 1], [], []>} : vector<8x8xbf16>, vector<8x8xbf16>, vector<8x8xf32> -> vector<8x8xf32>
    %150 = vector.broadcast %147 : vector<8x1xf32> to vector<8x8xf32>
    %151 = arith.mulf %149, %150 : vector<8x8xf32>
    %152 = vector.extract_strided_slice %131 {offsets = [0, 8], sizes = [8, 8], strides = [1, 1]} : vector<8x96xbf16> to vector<8x8xbf16>
    %153 = vector.extract_strided_slice %131 {offsets = [0, 40], sizes = [8, 8], strides = [1, 1]} : vector<8x96xbf16> to vector<8x8xbf16>
    %154 = vector.extract_strided_slice %131 {offsets = [0, 72], sizes = [8, 8], strides = [1, 1]} : vector<8x96xbf16> to vector<8x8xbf16>
    "tpu.trace_start"() <{level = 10 : i32, message = "qe,ke->qk"}> : () -> ()
    %cst_61 = arith.constant dense<0.000000e+00> : vector<8x8xf32>
    %155 = tpu.matmul %152, %153, %cst_61 {dimension_numbers = #tpu.dot_dimension_numbers<[1], [1], [0], [0], [0, 0, 1, 0], [], []>} : vector<8x8xbf16>, vector<8x8xbf16>, vector<8x8xf32> -> vector<8x8xf32>
    "tpu.trace_stop"() : () -> ()
    %cst_62 = arith.constant dense<0xFF800000> : vector<8xf32>
    %156 = vector.multi_reduction <maximumf>, %155, %cst_62 [1] : vector<8x8xf32> to vector<8xf32>
    %157 = vector.shape_cast %156 : vector<8xf32> to vector<8x1xf32>
    %158 = vector.broadcast %157 : vector<8x1xf32> to vector<8x8xf32>
    %159 = arith.subf %155, %158 : vector<8x8xf32>
    %160 = math.exp %159 : vector<8x8xf32>
    %cst_63 = arith.constant dense<0.000000e+00> : vector<8xf32>
    %161 = vector.multi_reduction <add>, %160, %cst_63 [1] : vector<8x8xf32> to vector<8xf32>
    %162 = vector.shape_cast %161 : vector<8xf32> to vector<8x1xf32>
    %163 = tpu.reciprocal %162 {approx = true} : vector<8x1xf32> -> vector<8x1xf32>
    %164 = arith.mulf %162, %163 : vector<8x1xf32>
    %cst_64 = arith.constant 2.000000e+00 : f32
    %165 = vector.broadcast %cst_64 : f32 to vector<8x1xf32>
    %166 = arith.subf %165, %164 : vector<8x1xf32>
    %167 = arith.mulf %163, %166 : vector<8x1xf32>
    %168 = arith.truncf %160 : vector<8x8xf32> to vector<8x8xbf16>
    %cst_65 = arith.constant dense<0.000000e+00> : vector<8x8xf32>
    %169 = tpu.matmul %168, %154, %cst_65 {dimension_numbers = #tpu.dot_dimension_numbers<[1], [0], [0], [1], [0, 0, 1, 1], [], []>} : vector<8x8xbf16>, vector<8x8xbf16>, vector<8x8xf32> -> vector<8x8xf32>
    %170 = vector.broadcast %167 : vector<8x1xf32> to vector<8x8xf32>
    %171 = arith.mulf %169, %170 : vector<8x8xf32>
    %172 = vector.extract_strided_slice %131 {offsets = [0, 16], sizes = [8, 8], strides = [1, 1]} : vector<8x96xbf16> to vector<8x8xbf16>
    %173 = vector.extract_strided_slice %131 {offsets = [0, 48], sizes = [8, 8], strides = [1, 1]} : vector<8x96xbf16> to vector<8x8xbf16>
    %174 = vector.extract_strided_slice %131 {offsets = [0, 80], sizes = [8, 8], strides = [1, 1]} : vector<8x96xbf16> to vector<8x8xbf16>
    "tpu.trace_start"() <{level = 10 : i32, message = "qe,ke->qk"}> : () -> ()
    %cst_66 = arith.constant dense<0.000000e+00> : vector<8x8xf32>
    %175 = tpu.matmul %172, %173, %cst_66 {dimension_numbers = #tpu.dot_dimension_numbers<[1], [1], [0], [0], [0, 0, 1, 0], [], []>} : vector<8x8xbf16>, vector<8x8xbf16>, vector<8x8xf32> -> vector<8x8xf32>
    "tpu.trace_stop"() : () -> ()
    %cst_67 = arith.constant dense<0xFF800000> : vector<8xf32>
    %176 = vector.multi_reduction <maximumf>, %175, %cst_67 [1] : vector<8x8xf32> to vector<8xf32>
    %177 = vector.shape_cast %176 : vector<8xf32> to vector<8x1xf32>
    %178 = vector.broadcast %177 : vector<8x1xf32> to vector<8x8xf32>
    %179 = arith.subf %175, %178 : vector<8x8xf32>
    %180 = math.exp %179 : vector<8x8xf32>
    %cst_68 = arith.constant dense<0.000000e+00> : vector<8xf32>
    %181 = vector.multi_reduction <add>, %180, %cst_68 [1] : vector<8x8xf32> to vector<8xf32>
    %182 = vector.shape_cast %181 : vector<8xf32> to vector<8x1xf32>
    %183 = tpu.reciprocal %182 {approx = true} : vector<8x1xf32> -> vector<8x1xf32>
    %184 = arith.mulf %182, %183 : vector<8x1xf32>
    %cst_69 = arith.constant 2.000000e+00 : f32
    %185 = vector.broadcast %cst_69 : f32 to vector<8x1xf32>
    %186 = arith.subf %185, %184 : vector<8x1xf32>
    %187 = arith.mulf %183, %186 : vector<8x1xf32>
    %188 = arith.truncf %180 : vector<8x8xf32> to vector<8x8xbf16>
    %cst_70 = arith.constant dense<0.000000e+00> : vector<8x8xf32>
    %189 = tpu.matmul %188, %174, %cst_70 {dimension_numbers = #tpu.dot_dimension_numbers<[1], [0], [0], [1], [0, 0, 1, 1], [], []>} : vector<8x8xbf16>, vector<8x8xbf16>, vector<8x8xf32> -> vector<8x8xf32>
    %190 = vector.broadcast %187 : vector<8x1xf32> to vector<8x8xf32>
    %191 = arith.mulf %189, %190 : vector<8x8xf32>
    %192 = vector.extract_strided_slice %131 {offsets = [0, 24], sizes = [8, 8], strides = [1, 1]} : vector<8x96xbf16> to vector<8x8xbf16>
    %193 = vector.extract_strided_slice %131 {offsets = [0, 56], sizes = [8, 8], strides = [1, 1]} : vector<8x96xbf16> to vector<8x8xbf16>
    %194 = vector.extract_strided_slice %131 {offsets = [0, 88], sizes = [8, 8], strides = [1, 1]} : vector<8x96xbf16> to vector<8x8xbf16>
    "tpu.trace_start"() <{level = 10 : i32, message = "qe,ke->qk"}> : () -> ()
    %cst_71 = arith.constant dense<0.000000e+00> : vector<8x8xf32>
    %195 = tpu.matmul %192, %193, %cst_71 {dimension_numbers = #tpu.dot_dimension_numbers<[1], [1], [0], [0], [0, 0, 1, 0], [], []>} : vector<8x8xbf16>, vector<8x8xbf16>, vector<8x8xf32> -> vector<8x8xf32>
    "tpu.trace_stop"() : () -> ()
    %cst_72 = arith.constant dense<0xFF800000> : vector<8xf32>
    %196 = vector.multi_reduction <maximumf>, %195, %cst_72 [1] : vector<8x8xf32> to vector<8xf32>
    %197 = vector.shape_cast %196 : vector<8xf32> to vector<8x1xf32>
    %198 = vector.broadcast %197 : vector<8x1xf32> to vector<8x8xf32>
    %199 = arith.subf %195, %198 : vector<8x8xf32>
    %200 = math.exp %199 : vector<8x8xf32>
    %cst_73 = arith.constant dense<0.000000e+00> : vector<8xf32>
    %201 = vector.multi_reduction <add>, %200, %cst_73 [1] : vector<8x8xf32> to vector<8xf32>
    %202 = vector.shape_cast %201 : vector<8xf32> to vector<8x1xf32>
    %203 = tpu.reciprocal %202 {approx = true} : vector<8x1xf32> -> vector<8x1xf32>
    %204 = arith.mulf %202, %203 : vector<8x1xf32>
    %cst_74 = arith.constant 2.000000e+00 : f32
    %205 = vector.broadcast %cst_74 : f32 to vector<8x1xf32>
    %206 = arith.subf %205, %204 : vector<8x1xf32>
    %207 = arith.mulf %203, %206 : vector<8x1xf32>
    %208 = arith.truncf %200 : vector<8x8xf32> to vector<8x8xbf16>
    %cst_75 = arith.constant dense<0.000000e+00> : vector<8x8xf32>
    %209 = tpu.matmul %208, %194, %cst_75 {dimension_numbers = #tpu.dot_dimension_numbers<[1], [0], [0], [1], [0, 0, 1, 1], [], []>} : vector<8x8xbf16>, vector<8x8xbf16>, vector<8x8xf32> -> vector<8x8xf32>
    %210 = vector.broadcast %207 : vector<8x1xf32> to vector<8x8xf32>
    %211 = arith.mulf %209, %210 : vector<8x8xf32>
    %212 = tpu.concatenate %151, %171, %191, %211 in 1 : vector<8x8xf32>, vector<8x8xf32>, vector<8x8xf32>, vector<8x8xf32> -> vector<8x32xf32>
    %213 = arith.truncf %212 : vector<8x32xf32> to vector<8x32xbf16>
    %cst_76 = arith.constant dense<0.000000e+00> : vector<8x32xf32>
    %214 = tpu.matmul %213, %120, %cst_76 {dimension_numbers = #tpu.dot_dimension_numbers<[1], [0], [0], [1], [0, 0, 1, 1], [], []>} : vector<8x32xbf16>, vector<32x32xbf16>, vector<8x32xf32> -> vector<8x32xf32>
    %215 = vector.broadcast %125 : vector<1x32xf32> to vector<8x32xf32>
    %216 = arith.addf %214, %215 : vector<8x32xf32>
    %217 = arith.subf %114, %216 : vector<8x32xf32>
    %218 = arith.truncf %217 : vector<8x32xf32> to vector<8x32xbf16>
    %cst_77 = arith.constant dense<0.000000e+00> : vector<8x32xf32>
    %219 = tpu.matmul %218, %122, %cst_77 {dimension_numbers = #tpu.dot_dimension_numbers<[1], [0], [0], [1], [0, 0, 1, 1], [], []>} : vector<8x32xbf16>, vector<32x32xbf16>, vector<8x32xf32> -> vector<8x32xf32>
    %220 = vector.broadcast %126 : vector<1x32xf32> to vector<8x32xf32>
    %221 = arith.addf %219, %220 : vector<8x32xf32>
    %cst_78 = arith.constant 0.000000e+00 : f32
    %222 = vector.broadcast %cst_78 : f32 to vector<8x32xf32>
    %223 = arith.cmpf oge, %221, %222 : vector<8x32xf32>
    %cst_79 = arith.constant 2.000000e-01 : f32
    %224 = vector.broadcast %cst_79 : f32 to vector<8x32xf32>
    %225 = arith.mulf %224, %221 : vector<8x32xf32>
    %226 = arith.select %223, %221, %225 : vector<8x32xi1>, vector<8x32xf32>
    %227 = arith.addf %114, %226 : vector<8x32xf32>
    %228 = arith.truncf %227 : vector<8x32xf32> to vector<8x32xbf16>
    %c0_80 = arith.constant 0 : index
    %c0_81 = arith.constant 0 : index
    %229 = vector.load %arg7[%c0_80, %c0_81] : memref<32x128xbf16, #tpu.memory_space<vmem>>, vector<32x128xbf16>
    %cst_82 = arith.constant dense<0.000000e+00> : vector<8x128xf32>
    %230 = tpu.matmul %228, %229, %cst_82 {dimension_numbers = #tpu.dot_dimension_numbers<[1], [0], [0], [1], [0, 0, 1, 1], [], []>} : vector<8x32xbf16>, vector<32x128xbf16>, vector<8x128xf32> -> vector<8x128xf32>
    %c0_83 = arith.constant 0 : index
    %c0_84 = arith.constant 0 : index
    %231 = vector.load %arg8[%c0_83, %c0_84] : memref<1x128xf32, #tpu.memory_space<vmem>>, vector<1x128xf32>
    %232 = vector.broadcast %231 : vector<1x128xf32> to vector<8x128xf32>
    %233 = arith.addf %230, %232 : vector<8x128xf32>
    %c0_85 = arith.constant 0 : index
    %c0_86 = arith.constant 0 : index
    %c0_87 = arith.constant 0 : index
    %234 = vector.load %arg9[%c0_85, %c0_86, %c0_87] : memref<1x8x128xf32, #tpu.memory_space<vmem>>, vector<1x8x128xf32>
    %235 = vector.shape_cast %234 : vector<1x8x128xf32> to vector<8x128xf32>
    %236 = vector.shape_cast %233 : vector<8x128xf32> to vector<1x8x128xf32>
    tpu.vector_store %arg9[%c0_85, %c0_86, %c0_87], %236 {strides = array<i32>} : memref<1x8x128xf32, #tpu.memory_space<vmem>>, vector<1x8x128xf32>,
    return
  }
  func.func @transform_0(%arg0: i32) -> (i32, i32, i32) {
    %c0_i32 = arith.constant 0 : i32
    %c0_i32_0 = arith.constant 0 : i32
    %c0_i32_1 = arith.constant 0 : i32
    return %arg0, %c0_i32, %c0_i32_0 : i32, i32, i32
  }
  func.func @transform_1(%arg0: i32) -> (i32, i32, i32) {
    %c0_i32 = arith.constant 0 : i32
    %c0_i32_0 = arith.constant 0 : i32
    %c0_i32_1 = arith.constant 0 : i32
    %c0_i32_2 = arith.constant 0 : i32
    return %c0_i32, %c0_i32_0, %c0_i32_1 : i32, i32, i32
  }
  func.func @transform_2(%arg0: i32) -> (i32, i32, i32) {
    %c0_i32 = arith.constant 0 : i32
    %c0_i32_0 = arith.constant 0 : i32
    %c0_i32_1 = arith.constant 0 : i32
    %c0_i32_2 = arith.constant 0 : i32
    return %c0_i32, %c0_i32_0, %c0_i32_1 : i32, i32, i32
  }
  func.func @transform_3(%arg0: i32) -> (i32, i32, i32) {
    %c0_i32 = arith.constant 0 : i32
    %c0_i32_0 = arith.constant 0 : i32
    %c0_i32_1 = arith.constant 0 : i32
    %c0_i32_2 = arith.constant 0 : i32
    return %c0_i32, %c0_i32_0, %c0_i32_1 : i32, i32, i32
  }
  func.func @transform_4(%arg0: i32) -> (i32, i32, i32) {
    %c0_i32 = arith.constant 0 : i32
    %c0_i32_0 = arith.constant 0 : i32
    %c0_i32_1 = arith.constant 0 : i32
    %c0_i32_2 = arith.constant 0 : i32
    return %c0_i32, %c0_i32_0, %c0_i32_1 : i32, i32, i32
  }
  func.func @transform_5(%arg0: i32) -> (i32, i32, i32) {
    %c0_i32 = arith.constant 0 : i32
    %c0_i32_0 = arith.constant 0 : i32
    %c0_i32_1 = arith.constant 0 : i32
    %c0_i32_2 = arith.constant 0 : i32
    return %c0_i32, %c0_i32_0, %c0_i32_1 : i32, i32, i32
  }
  func.func @transform_6(%arg0: i32) -> (i32, i32) {
    %c0_i32 = arith.constant 0 : i32
    %c0_i32_0 = arith.constant 0 : i32
    %c0_i32_1 = arith.constant 0 : i32
    return %c0_i32, %c0_i32_0 : i32, i32
  }
  func.func @transform_7(%arg0: i32) -> (i32, i32) {
    %c0_i32 = arith.constant 0 : i32
    %c0_i32_0 = arith.constant 0 : i32
    %c0_i32_1 = arith.constant 0 : i32
    return %c0_i32, %c0_i32_0 : i32, i32
  }
  func.func @transform_8(%arg0: i32) -> (i32, i32, i32) {
    %c0_i32 = arith.constant 0 : i32
    %c0_i32_0 = arith.constant 0 : i32
    %c0_i32_1 = arith.constant 0 : i32
    return %arg0, %c0_i32, %c0_i32_0 : i32, i32, i32
  }
}

</mosaic_0001>

<bundles_post_ra>
// kernel: point_decoder_forward.1
= control target key start
LH: loop header
LB: loop body
LE: loop exit
PB: predicated region body
PF: predicated region fallthrough
CT: control target
= control target key end

     0   :  { %13 = vsyncpa [#allocation3], 0  ;;  %s2652_s0 = inlined_call_operand.vmem [shape: f32[2,8,32], index: 0, kind: input, shape index: {}]   ;;  %s2653_s1 = inlined_call_operand.vmem [shape: bf16[2,32,96], index: 1, kind: input, shape index: {}]   ;;  %s2654_s2 = inlined_call_operand.vmem [shape: f32[2,1,96], index: 2, kind: input, shape index: {}]   ;;  %s2655_s3 = inlined_call_operand.hbm [shape: bf16[2,32,32], index: 3, kind: input, shape index: {}]   ;;  %s2656_s4 = inlined_call_operand.vmem [shape: f32[2,2,32], index: 4, kind: input, shape index: {}]   ;;  %s2657_s5 = inlined_call_operand.hbm [shape: bf16[2,32,32], index: 5, kind: input, shape index: {}]   ;;  %s2658_s6 = inlined_call_operand.vmem [shape: bf16[32,128], index: 6, kind: input, shape index: {}]   ;;  %s2659_s7 = inlined_call_operand.vmem [shape: f32[1,128], index: 7, kind: input, shape index: {}]   ;;  %s2660_s8 = inlined_call_operand.vmem [shape: f32[2,8,128], index: 8, kind: output, shape index: {}]  }
   0x1   :  { %14 = vsyncpa [#allocation5], 0  ;;  %s2316_s27 = smov 0  }
   0x2 LB: > { %s2322_s28 = sadd.s32 4294967295, %s2249_s27   ;;  %p1824_p0 = scmp.ge.s32.totalorder %s2249_s27, 1  ;;  %s2249_s27 = sphi %s2316_s27, %s20_s27  }
   0x3   : > { %p224_p1 = scmp.lt.s32.totalorder %s2249_s27, 3  ;;  %s2251_s29 = smov [#allocation2]  }
   0x4   : > { %s242_s30 = sshll.u32 %s2251_s29, 4  ;;  %p2661_p3 = scmp.eq.s32.totalorder %s2322_s28, 0  ;;  %s243_s30 = int_to_ptr.vmem [resolvable:$true] %s242_s30 }
   0x5   : > { %p2326_p2 = pnand %p1824_p0, %p224_p1  ;;  %s2252_s10 = smov [#allocation4]  }
   0x6   : > { %s258_s11 = sshll.u32 %s2252_s10, 4  ;;  %s2179_s15 = scalar_lea.hbm %s2655_s3, 512  ;;  %s2339_s11 = int_to_ptr.vmem [resolvable:$true] %s258_s11 }
   0x7   : > { %s2663_s9 = scalar_select %p2326_p2, 1, 0 }
   0x8   : > { %p2094_p4 = pneg %p2326_p2  ;;  %p2180_p6 = scmp.ne.s32.totalorder %s2655_s3, %s2179_s15 }
   0x9   : > { %p2186_p10 = scmp.lt.u32.totalorder %s2179_s15, %s2655_s3 }
   0xa   : > { %p2335_p5 = pnand %p2661_p3, %p2094_p4 }
   0xc   : > { %p2181_p7 = pneg %p2335_p5 }
   0xe   : > { %p2182_p8 = pnand %p2181_p7, %p2180_p6 }
  0x10   : > { %p2183_p9 = pneg %p2182_p8 }
  0x12   : > { %p2188_p11 = pnand %p2186_p10, %p2183_p9 }
  0x14   : > { %2191 = shalt.err (!%p2188_p11)
}
  0x15   : > { %s2192_s20 = scalar_lea.vmem %s243_s30, 512  ;;  %p2200_p1 = scmp.lt.s32.totalorder %s243_s30, %s243_s30 }
  0x16   : > { %p2193_p12 = scmp.ne.s32.totalorder %s243_s30, %s2192_s20  ;;  %p2201_p4 = scmp.lt.s32.totalorder %s2192_s20, %s2192_s20 }
  0x18   : > { %p2195_p13 = pnand %p2193_p12, %p2181_p7  ;;  %p2202_p3 = por %p2201_p4, %p2200_p1 }
  0x1a   : > { %p2196_p0 = pneg %p2195_p13 }
  0x1c   : > { %p2203_p2 = pnand %p2202_p3, %p2196_p0 }
  0x1e   : > { %2206 = shalt.err (!%p2203_p2)
}
  0x1f   : > { %s2253_s21 = smov 64   ;;  %s2254_s22 = smov 4  }
  0x20   : > { %2097 = dma.hbm_to_vmem [thread:$0]  (!%p2335_p5), %s2655_s3, 512, %s243_s30, [#allocation3], %s2253_s21, %s2253_s21, %s2254_s22  }
  0x21   : > { %s2207_s29 = scalar_lea.hbm %s2657_s5, 512 }
  0x22   : > { %p2208_p6 = scmp.ne.s32.totalorder %s2657_s5, %s2207_s29  ;;  %p2214_p8 = scmp.lt.u32.totalorder %s2207_s29, %s2657_s5 }
  0x24   : > { %p2210_p2 = pnand %p2208_p6, %p2181_p7 }
  0x26   : > { %p2211_p3 = pneg %p2210_p2 }
  0x28   : > { %p2216_p9 = pnand %p2214_p8, %p2211_p3 }
  0x2a   : > { %2219 = shalt.err (!%p2216_p9)
}
  0x2b   : > { %s2220_s30 = scalar_lea.vmem %s2339_s11, 512  ;;  %p2228_p13 = scmp.lt.s32.totalorder %s2339_s11, %s2339_s11 }
  0x2c   : > { %p2221_p10 = scmp.ne.s32.totalorder %s2339_s11, %s2220_s30  ;;  %p2229_p0 = scmp.lt.s32.totalorder %s2220_s30, %s2220_s30 }
  0x2e   : > { %p2223_p11 = pnand %p2221_p10, %p2181_p7  ;;  %p2230_p1 = por %p2229_p0, %p2228_p13 }
  0x30   : > { %p2224_p12 = pneg %p2223_p11 }
  0x32   : > { %p2231_p4 = pnand %p2230_p1, %p2224_p12 }
  0x34   : > { %2234 = shalt.err (!%p2231_p4)
}
  0x35   : > { %2100 = dma.hbm_to_vmem [thread:$0]  (!%p2335_p5), %s2657_s5, 512, %s2339_s11, [#allocation5], %s2253_s21, %s2253_s21, %s2254_s22  }
  0x36   : > { %p2665_p6 = scmp.ne.s32.totalorder %s2663_s9, 0 }
  0x37   : > { %p2666_p2 = scmp.eq.s32.totalorder (!%p2665_p6), %s2322_s28, 0 }
  0x38   : > { %287 = sbr.rel (%p2665_p6) target bundleno = 3362 (0xd22), region = 52 }
  0x3f   : > { %2240 = dma.done.wait (%p2666_p2), [#allocation3], 512   ;;  %p2667_p7 = pmov %p2666_p2 }
  0x40   : > { %p2668_p3 = pmov %p2666_p2 }
  0x41   : > { %2242 = vsyncadd (%p2667_p7), [#allocation3], 4294966784 }
  0x42   : > { %2244 = dma.done.wait (%p2668_p3), [#allocation5], 512   ;;  %p2669_p8 = pmov %p2666_p2 }
  0x43   : > { %p323_p9 = scmp.lt.s32.totalorder %s2322_s28, 1  ;;  %v2255_v0 = vmov 0.0   ;;  %vm2256_vm0 = vmmov 0   ;;  %v2133_v1 = vld [vmem:[%s2653_s1] sm:$0xff]   ;;  %v2134_v2 = vld [vmem:[%s2653_s1 + $0x8] sm:$0xff]   ;;  %vm366_vm1 = vcmask 261120  }
  0x44   : > { %2246 = vsyncadd (%p2669_p8), [#allocation5], 4294966784  ;;  %1934 = vmatprep.subr.bf16.mxu0 %v2255_v0  ;;  %1938 = vmatprep.mubr.msk.bf16.mxu0 %vm2256_vm0, %v2255_v0  ;;  %v1833_v5 = vld [vmem:[%s2654_s2] ss:$0 sm:$0xff]  ;;  %s2257_s25 = smov 120   ;;  %s2258_s26 = smov 96  }
  0x45   : > { %s2671_s28 = smov (!%p323_p9, %s2322_s28), 1  ;;  %1942 = vmatprep.subr.bf16.mxu1 %v2255_v0  ;;  %1944 = vmatprep.mubr.msk.bf16.mxu1 %vm2256_vm0, %v2255_v0  ;;  %s2259_s29 = smov 80   ;;  %vm414_vm2 = vcmask 64512   ;;  %vm480_vm3 = vcmask 1043456   ;;  %vm877_vm4 = vcmask 130048   ;;  %vm879_vm5 = vcmask 195584  }
  0x46   : > { %s1831_s9 = sshll.u32 %s2671_s28, 3  ;;  %1935 = vmatpush3.bf16.msra.mxu0 %v2133_v1  ;;  %s2260_s10 = smov 88  }
  0x47   : > { %s326_s18 = scalar_lea.vmem %s2652_s0, %s1831_s9  ;;  %1936 = vmatprep.subr.bf16.mxu0 %v2255_v0  ;;  %s2261_s13 = smov 72  }
  0x48   : > { %v2420_v3 = vld [vmem:[%s326_s18] sm:$0xff]  ;;  %s2262_s14 = smov 112   ;;  %s2263_s15 = smov 104  }
  0x49   : > { %v347_v4 = vpack.c.bf16 %v2420_v3, %v2420_v3  ;;  %s2264_s30 = smov 56   ;;  %s2265_s16 = smov 64  }
  0x4a   : > { %1937 = vmatpush3.bf16.msra.mxu0 %v2134_v2  ;;  %s2266_s17 = smov 40   ;;  %s2267_s11 = smov 48  }
  0x4b   : > { %1948 = vmatprep.subr.bf16.mxu0 %v2255_v0  ;;  %s2268_s12 = smov 8   ;;  %s2269_s18 = smov 16  }
  0x4c   : > { %s2270_s19 = smov 24  }
  0x4d   : > { %1939 = vmatmul.mubr.msk.bf16.vlgmr.msra.gmra.mrb[0].mxu0 %vm366_vm1, %v347_v4 }
  0x4e   : > { %1950 = vmatprep.mubr.msk.bf16.mxu0 %vm2256_vm0, %v2255_v0 }
 0x120   : > { %v404_v6 = vpop.f32.mrb[0].mxu0 }
 0x121   : > { %v405_v7 = vadd.f32 %v1833_v5, %v404_v6  ;;  %v1940_v8 = vpop.f32.mrb[1].mxu0 }
 0x122   : > { %v407_v9 = vpop.f32.mrb[2].mxu0 }
 0x123   : > { %v2432_v10 = vpack.c.bf16 %v405_v7, %v405_v7  ;;  %v1941_v11 = vpop.f32.mrb[3].mxu0 }
 0x125   : > { %525 = vrot.lane.b32.xlu1 %v2432_v10, %s2257_s25  ;;  %412 = vrot.lane.b32.xlu0 %v2432_v10, %s2258_s26 }
 0x129   : > { %640 = vrot.lane.b32.xlu1 %v2432_v10, %s2259_s29  ;;  %527 = vrot.lane.b32.xlu0 %v2432_v10, %s2260_s10 }
 0x12d   : > { %753 = vrot.lane.b32.xlu1 %v2432_v10, %s2261_s13  ;;  %638 = vrot.lane.b32.xlu0 %v2432_v10, %s2262_s14 }
 0x131   : > { %751 = vrot.lane.b32.xlu0 %v2432_v10, %s2263_s15 }
 0x197   : > { %v413_v12 = vpop.permute.xlu0 %412  ;;  %v526_v15 = vpop.permute.xlu1 %525 }
 0x198   : > { %v419_v13 = vsel %vm414_vm2, %v413_v12, 0 }
 0x199   : > { %1943 = vmatpush3.bf16.xpose.msra.mxu1 %v419_v13 }
 0x19a   : > { %1954 = vmatprep.subr.bf16.mxu1 %v2255_v0 }
 0x19b   : > { %v528_v14 = vpop.permute.xlu0 %527  ;;  %v641_v17 = vpop.permute.xlu1 %640 }
 0x19c   : > { %v533_v16 = vsel %vm414_vm2, %v528_v14, 0  ;;  %v646_v18 = vsel %vm414_vm2, %v641_v17, 0 }
 0x19f   : > { %v754_v19 = vpop.permute.xlu1 %753  ;;  %v639_v20 = vpop.permute.xlu0 %638 }
 0x1a0   : > { %1945 = vmatmul.mubr.msk.bf16.vlgmr.msra.gmra.mrb[0].mxu1 %vm414_vm2, %v2432_v10  ;;  %v759_v21 = vsel %vm414_vm2, %v754_v19, 0 }
 0x1a1   : > { %1955 = vmatpush3.bf16.xpose.msra.mxu1 %v533_v16  ;;  %1956 = vmatprep.mubr.msk.bf16.mxu1 %vm2256_vm0, %v2255_v0 }
 0x1a2   : > { %1966 = vmatprep.subr.bf16.mxu1 %v2255_v0 }
 0x1a3   : > { %v752_v22 = vpop.permute.xlu0 %751 }
 0x1a8   : > { %1957 = vmatmul.mubr.msk.bf16.vlgmr.msra.gmra.mrb[4].mxu1 %vm414_vm2, %v526_v15 }
 0x1a9   : > { %1967 = vmatpush3.bf16.xpose.msra.mxu1 %v646_v18  ;;  %1968 = vmatprep.mubr.msk.bf16.mxu1 %vm2256_vm0, %v2255_v0 }
 0x1aa   : > { %1978 = vmatprep.subr.bf16.mxu1 %v2255_v0 }
 0x1b0   : > { %1969 = vmatmul.mubr.msk.bf16.vlgmr.msra.gmra.mrb[8].mxu1 %vm414_vm2, %v639_v20 }
 0x1b1   : > { %1979 = vmatpush3.bf16.xpose.msra.mxu1 %v759_v21  ;;  %1980 = vmatprep.mubr.msk.bf16.mxu1 %vm2256_vm0, %v2255_v0 }
 0x1b2   : > { %1990 = vmatprep.subr.bf16.mxu1 %v2255_v0 }
 0x1b8   : > { %1981 = vmatmul.mubr.msk.bf16.vlgmr.msra.gmra.mrb[12].mxu1 %vm414_vm2, %v752_v22 }
 0x1b9   : > { %1994 = vmatprep.mubr.msk.bf16.mxu1 %vm2256_vm0, %v2255_v0 }
 0x273   : > { %v455_v23 = vpop.f32.mrb[0].mxu1 }
 0x274   : > { %v1946_v24 = vpop.f32.mrb[1].mxu1  ;;  %v461_v25 = vsel %vm414_vm2, %v455_v23, -inf }
 0x275   : > { %462 = vmax.xlane.f32.xlu1 %v461_v25  ;;  %v458_v26 = vpop.f32.mrb[2].mxu1 }
 0x276   : > { %v1947_v27 = vpop.f32.mrb[3].mxu1 }
 0x27b   : > { %v569_v28 = vpop.f32.mrb[4].mxu1 }
 0x27c   : > { %v1958_v29 = vpop.f32.mrb[5].mxu1  ;;  %v575_v30 = vsel %vm414_vm2, %v569_v28, -inf }
 0x27d   : > { %576 = vmax.xlane.f32.xlu0 %v575_v30  ;;  %v572_v31 = vpop.f32.mrb[6].mxu1  ;;  %v2135_v30 = vld [vmem:[#allocation2] sm:$0xff]  }
 0x27e   : > { %v1959_v32 = vpop.f32.mrb[7].mxu1  ;;  %1991 = vmatpush3.bf16.msra.mxu1 %v2135_v30 }
 0x27f   : > { %1992 = vmatprep.subr.bf16.mxu1 %v2255_v0 }
 0x283   : > { %v682_v33 = vpop.f32.mrb[8].mxu1 }
 0x284   : > { %v1970_v34 = vpop.f32.mrb[9].mxu1  ;;  %v688_v35 = vsel %vm414_vm2, %v682_v33, -inf }
 0x285   : > { %689 = vmax.xlane.f32.xlu0 %v688_v35  ;;  %v685_v36 = vpop.f32.mrb[10].mxu1  ;;  %v2136_v34 = vld [vmem:[#allocation2 + $0x8] sm:$0xff]  }
 0x286   : > { %589 = vrot.lane.b32.xlu1 %v2432_v10, %s2264_s30  ;;  %v1971_v37 = vpop.f32.mrb[11].mxu1  ;;  %1993 = vmatpush3.bf16.msra.mxu1 %v2136_v34 }
 0x287   : > { %2006 = vmatprep.subr.bf16.mxu1 %v2255_v0 }
 0x28b   : > { %v795_v38 = vpop.f32.mrb[12].mxu1 }
 0x28c   : > { %v1982_v39 = vpop.f32.mrb[13].mxu1  ;;  %v801_v42 = vsel %vm414_vm2, %v795_v38, -inf }
 0x28d   : > { %v798_v40 = vpop.f32.mrb[14].mxu1 }
 0x28e   : > { %v1983_v41 = vpop.f32.mrb[15].mxu1 }
 0x29b   : > { %475 = vrot.lane.b32.xlu0 %v2432_v10, %s2265_s16 }
 0x29f   : > { %815 = vrot.lane.b32.xlu0 %v2432_v10, %s2266_s17 }
 0x2aa   : > { %802 = vmax.xlane.f32.xlu1 %v801_v42 }
 0x2bb   : > { %702 = vrot.lane.b32.xlu1 %v2432_v10, %s2267_s11 }
 0x302   : > { %v463_v43 = vpop.xlane.xlu1 %462 }
 0x303   : > { %v464_v44 = vsub.f32 %v455_v23, %v463_v43 }
 0x305   : > { %v465_v45 = vmul.f32 1.442695, %v464_v44 }
 0x306   : > { %v590_v55 = vpop.permute.xlu1 %589 }
 0x307   : > { %2147 = vpow2.f32 %v465_v45  ;;  %v595_v59 = vsel %vm480_vm3, %v590_v55, 0 }
 0x30a   : > { %v577_v46 = vpop.xlane.xlu0 %576 }
 0x30b   : > { %v578_v47 = vsub.f32 %v569_v28, %v577_v46 }
 0x30d   : > { %v579_v48 = vmul.f32 1.442695, %v578_v47 }
 0x30f   : > { %2149 = vpow2.f32 %v579_v48 }
 0x311   : > { %v2148_v52 = vpop.eup %2147 }
 0x312   : > { %v690_v49 = vpop.xlane.xlu0 %689  ;;  %v474_v57 = vpack.c.bf16 %v2148_v52, %v2148_v52  ;;  %v467_v60 = vsel %vm414_vm2, %v2148_v52, 0.0 }
 0x313   : > { %v691_v50 = vsub.f32 %v682_v33, %v690_v49 }
 0x315   : > { %v692_v51 = vmul.f32 1.442695, %v691_v50 }
 0x316   : > { %v476_v53 = vpop.permute.xlu0 %475 }
 0x317   : > { %2151 = vpow2.f32 %v692_v51  ;;  %v482_v54 = vsel %vm480_vm3, %v476_v53, 0 }
 0x318   : > { %1949 = vmatpush3.bf16.msra.mxu0 %v482_v54 }
 0x319   : > { %v2150_v56 = vpop.eup %2149  ;;  %1960 = vmatprep.subr.bf16.mxu0 %v2255_v0 }
 0x31a   : > { %v581_v58 = vsel %vm414_vm2, %v2150_v56, 0.0  ;;  %v588_v62 = vpack.c.bf16 %v2150_v56, %v2150_v56  ;;  %v816_v7 = vpop.permute.xlu0 %815 }
 0x31b   : > { %582 = vadd.xlane.f32.xlu1 %v581_v58  ;;  %1951 = vmatmul.mubr.msk.bf16.vlgmr.msra.gmra.mrb[4].mxu0 %vm414_vm2, %v474_v57  ;;  %v821_v9 = vsel %vm480_vm3, %v816_v7, 0 }
 0x31c   : > { %1961 = vmatpush3.bf16.msra.mxu0 %v595_v59  ;;  %1962 = vmatprep.mubr.msk.bf16.mxu0 %vm2256_vm0, %v2255_v0 }
 0x31d   : > { %1972 = vmatprep.subr.bf16.mxu0 %v2255_v0 }
 0x31f   : > { %468 = vadd.xlane.f32.xlu1 %v467_v60 }
 0x321   : > { %v2152_v61 = vpop.eup %2151 }
 0x322   : > { %v694_v63 = vsel %vm414_vm2, %v2152_v61, 0.0  ;;  %v701_v8 = vpack.c.bf16 %v2152_v61, %v2152_v61 }
 0x323   : > { %695 = vadd.xlane.f32.xlu0 %v694_v63  ;;  %1963 = vmatmul.mubr.msk.bf16.vlgmr.msra.gmra.mrb[8].mxu0 %vm414_vm2, %v588_v62  ;;  %v2137_v62 = vld [vmem:[#allocation4] sm:$0xff]   ;;  %v2138_v63 = vld [vmem:[#allocation4 + $0x8] sm:$0xff]  }
 0x324   : > { %1974 = vmatprep.mubr.msk.bf16.mxu0 %vm2256_vm0, %v2255_v0 }
 0x337   : > { %v803_v1 = vpop.xlane.xlu1 %802 }
 0x338   : > { %v804_v2 = vsub.f32 %v795_v38, %v803_v1  ;;  %v882_v1 = vlaneseq }
 0x33a   : > { %v805_v4 = vmul.f32 1.442695, %v804_v2  ;;  %v2518_v2 = vshrl.u32 %v882_v1, 7 }
 0x33b   : > { %v703_v5 = vpop.permute.xlu1 %702 }
 0x33c   : > { %2153 = vpow2.f32 %v805_v4  ;;  %v708_v6 = vsel %vm480_vm3, %v703_v5, 0  ;;  %v884_v4 = vsub.s32 0, %v2518_v2  ;;  %v346_v5 = vld [vmem:[%s2656_s4] sm:$0x3] }
 0x33d   : > { %1973 = vmatpush3.bf16.msra.mxu0 %v708_v6 }
 0x33e   : > { %1984 = vmatprep.subr.bf16.mxu0 %v2255_v0  ;;  %v885_v6 = vrot.slane %v346_v5, %v884_v4 }
 0x340   : > { %1975 = vmatmul.mubr.msk.bf16.vlgmr.msra.gmra.mrb[12].mxu0 %vm414_vm2, %v701_v8 }
 0x341   : > { %1985 = vmatpush3.bf16.msra.mxu0 %v821_v9  ;;  %1986 = vmatprep.mubr.msk.bf16.mxu0 %vm2256_vm0, %v2255_v0 }
 0x342   : > { %1998 = vmatprep.subr.bf16.mxu0 %v2255_v0 }
 0x346   : > { %v2154_v10 = vpop.eup %2153 }
 0x347   : > { %v807_v11 = vsel %vm414_vm2, %v2154_v10, 0.0  ;;  %v814_v12 = vpack.c.bf16 %v2154_v10, %v2154_v10 }
 0x348   : > { %808 = vadd.xlane.f32.xlu0 %v807_v11 }
 0x349   : > { %1987 = vmatmul.mubr.msk.bf16.vlgmr.msra.gmra.mrb[16].mxu0 %vm414_vm2, %v814_v12 }
 0x34a   : > { %2002 = vmatprep.mubr.msk.bf16.mxu0 %vm2256_vm0, %v2255_v0  ;;  %1999 = vmatpush3.bf16.msra.mxu0 %v2137_v62 }
 0x34b   : > { %2000 = vmatprep.subr.bf16.mxu0 %v2255_v0 }
 0x34e   : > { %2001 = vmatpush3.bf16.msra.mxu0 %v2138_v63 }
 0x34f   : > { %2014 = vmatprep.subr.bf16.mxu0 %v2255_v0 }
 0x3a8   : > { %v583_v13 = vpop.xlane.xlu1 %582 }
 0x3a9   : > { %2155 = vrcp.f32 %v583_v13 }
 0x3ac   : > { %v469_v49 = vpop.xlane.xlu1 %468 }
 0x3b0   : > { %v696_v27 = vpop.xlane.xlu0 %695 }
 0x3b1   : > { %2157 = vrcp.f32 %v696_v27 }
 0x3b3   : > { %v2156_v14 = vpop.eup %2155 }
 0x3b4   : > { %v585_v15 = vmul.f32 %v2156_v14, %v583_v13 }
 0x3b6   : > { %v586_v19 = vsub.f32 2.0, %v585_v15  ;;  %v2140_v15 = vld [vmem:[%s2653_s1 + $0x18] sm:$0xff]  }
 0x3b8   : > { %v587_v21 = vmul.f32 %v2156_v14, %v586_v19  ;;  %v2139_v14 = vld [vmem:[%s2653_s1 + $0x10] sm:$0xff]  }
 0x3bb   : > { %v2158_v29 = vpop.eup %2157 }
 0x3bc   : > { %v698_v31 = vmul.f32 %v2158_v29, %v696_v27  ;;  %v1857_v27 = vld [vmem:[%s2654_s2 + $0x1] ss:$0 sm:$0xff] }
 0x3be   : > { %v699_v32 = vsub.f32 2.0, %v698_v31 }
 0x3c0   : > { %v700_v35 = vmul.f32 %v2158_v29, %v699_v32 }
 0x3d5   : > { %v809_v28 = vpop.xlane.xlu0 %808 }
 0x3d6   : > { %2159 = vrcp.f32 %v809_v28 }
 0x3d7   : > { %2161 = vrcp.f32 %v469_v49 }
 0x3e0   : > { %v2160_v33 = vpop.eup %2159 }
 0x3e1   : > { %v811_v36 = vmul.f32 %v2160_v33, %v809_v28  ;;  %v2162_v50 = vpop.eup %2161 }
 0x3e2   : > { %v471_v51 = vmul.f32 %v2162_v50, %v469_v49 }
 0x3e3   : > { %v812_v42 = vsub.f32 2.0, %v811_v36 }
 0x3e4   : > { %v472_v52 = vsub.f32 2.0, %v471_v51 }
 0x3e5   : > { %v813_v43 = vmul.f32 %v2160_v33, %v812_v42 }
 0x3e6   : > { %v473_v53 = vmul.f32 %v2162_v50, %v472_v52 }
 0x3ee   : > { %v518_v16 = vpop.f32.mrb[4].mxu0 }
 0x3ef   : > { %v1952_v17 = vpop.f32.mrb[5].mxu0  ;;  %v524_v56 = vmul.f32 %v518_v16, %v473_v53  ;;  %v945_v16 = vsub.s32 1, %v2518_v2 }
 0x3f0   : > { %v521_v18 = vpop.f32.mrb[6].mxu0 }
 0x3f1   : > { %v1953_v20 = vpop.f32.mrb[7].mxu0  ;;  %v946_v17 = vrot.slane %v346_v5, %v945_v16 }
 0x3f6   : > { %v631_v22 = vpop.f32.mrb[8].mxu0 }
 0x3f7   : > { %v637_v23 = vmul.f32 %v631_v22, %v587_v21  ;;  %v1964_v24 = vpop.f32.mrb[9].mxu0 }
 0x3f8   : > { %v634_v25 = vpop.f32.mrb[10].mxu0 }
 0x3f9   : > { %865 = vrot.lane.b32.xlu0 %v637_v23, %s2268_s12  ;;  %v1965_v26 = vpop.f32.mrb[11].mxu0 }
 0x413   : > { %v744_v37 = vpop.f32.mrb[12].mxu0 }
 0x414   : > { %v750_v38 = vmul.f32 %v744_v37, %v700_v35  ;;  %v1976_v39 = vpop.f32.mrb[13].mxu0 }
 0x415   : > { %v747_v40 = vpop.f32.mrb[14].mxu0 }
 0x416   : > { %869 = vrot.lane.b32.xlu1 %v750_v38, %s2269_s18  ;;  %v1977_v41 = vpop.f32.mrb[15].mxu0 }
 0x41c   : > { %v857_v44 = vpop.f32.mrb[16].mxu0 }
 0x41d   : > { %v863_v45 = vmul.f32 %v857_v44, %v813_v43  ;;  %v1988_v46 = vpop.f32.mrb[17].mxu0 }
 0x41e   : > { %v860_v47 = vpop.f32.mrb[18].mxu0 }
 0x41f   : > { %873 = vrot.lane.b32.xlu1 %v863_v45, %s2270_s19  ;;  %v1989_v48 = vpop.f32.mrb[19].mxu0 }
 0x46b   : > { %v866_v54 = vpop.permute.xlu0 %865 }
 0x46c   : > { %v876_v57 = vsel %vm414_vm2, %v524_v56, %v866_v54 }
 0x488   : > { %v870_v55 = vpop.permute.xlu1 %869 }
 0x489   : > { %v878_v58 = vsel %vm877_vm4, %v876_v57, %v870_v55 }
 0x491   : > { %v874_v59 = vpop.permute.xlu1 %873 }
 0x492   : > { %v880_v60 = vsel %vm879_vm5, %v878_v58, %v874_v59 }
 0x493   : > { %v881_v61 = vpack.c.bf16 %v880_v60, %v880_v60 }
 0x495   : > { %1995 = vmatmul.mubr.msk.bf16.vlgmr.msra.gmra.mrb[16].mxu1 %vm366_vm1, %v881_v61 }
 0x496   : > { %2010 = vmatprep.mubr.msk.bf16.mxu1 %vm2256_vm0, %v2255_v0  ;;  %2007 = vmatpush3.bf16.msra.mxu1 %v2139_v14 }
 0x497   : > { %2008 = vmatprep.subr.bf16.mxu1 %v2255_v0 }
 0x49a   : > { %2009 = vmatpush3.bf16.msra.mxu1 %v2140_v15 }
 0x49b   : > { %2020 = vmatprep.subr.bf16.mxu1 %v2255_v0 }
 0x568   : > { %v935_v7 = vpop.f32.mrb[16].mxu1 }
 0x569   : > { %v936_v8 = vadd.f32 %v935_v7, %v885_v6  ;;  %v1996_v9 = vpop.f32.mrb[17].mxu1 }
 0x56a   : > { %v938_v10 = vpop.f32.mrb[18].mxu1 }
 0x56b   : > { %v941_v11 = vsub.f32 %v2420_v3, %v936_v8  ;;  %v1997_v12 = vpop.f32.mrb[19].mxu1 }
 0x56d   : > { %v942_v13 = vpack.c.bf16 %v941_v11, %v941_v11 }
 0x56f   : > { %2003 = vmatmul.mubr.msk.bf16.vlgmr.msra.gmra.mrb[20].mxu0 %vm366_vm1, %v942_v13 }
 0x570   : > { %2016 = vmatprep.mubr.msk.bf16.mxu0 %vm2256_vm0, %v2255_v0 }
 0x642   : > { %v996_v18 = vpop.f32.mrb[20].mxu0 }
 0x643   : > { %v997_v19 = vadd.f32 %v996_v18, %v946_v17  ;;  %v2004_v20 = vpop.f32.mrb[21].mxu0 }
 0x644   : > { %v999_v21 = vpop.f32.mrb[22].mxu0 }
 0x645   : > { %vm1002_vm6 = vcmp.ge.f32.partialorder %v997_v19, 0.0  ;;  %v1003_v22 = vmul.f32 0.2, %v997_v19  ;;  %v2005_v23 = vpop.f32.mrb[23].mxu0 }
 0x647   : > { %v1004_v24 = vsel %vm1002_vm6, %v997_v19, %v1003_v22 }
 0x648   : > { %v2542_v25 = vadd.f32 %v1004_v24, %v2420_v3 }
 0x64a   : > { %v1025_v26 = vpack.c.bf16 %v2542_v25, %v2542_v25 }
 0x64c   : > { %2011 = vmatmul.mubr.msk.bf16.vlgmr.msra.gmra.mrb[20].mxu1 %vm366_vm1, %v1025_v26 }
 0x64d   : > { %2022 = vmatprep.mubr.msk.bf16.mxu1 %vm2256_vm0, %v2255_v0 }
 0x71f   : > { %v1081_v28 = vpop.f32.mrb[20].mxu1 }
 0x720   : > { %v1082_v29 = vadd.f32 %v1857_v27, %v1081_v28  ;;  %v2012_v30 = vpop.f32.mrb[21].mxu1 }
 0x721   : > { %v1084_v31 = vpop.f32.mrb[22].mxu1 }
 0x722   : > { %v1087_v32 = vpack.c.bf16 %v1082_v29, %v1082_v29  ;;  %v2013_v33 = vpop.f32.mrb[23].mxu1 }
 0x724   : > { %1202 = vrot.lane.b32.xlu1 %v1087_v32, %s2260_s10  ;;  %1089 = vrot.lane.b32.xlu0 %v1087_v32, %s2258_s26 }
 0x728   : > { %1315 = vrot.lane.b32.xlu1 %v1087_v32, %s2259_s29  ;;  %1200 = vrot.lane.b32.xlu0 %v1087_v32, %s2257_s25 }
 0x72c   : > { %1428 = vrot.lane.b32.xlu1 %v1087_v32, %s2261_s13  ;;  %1313 = vrot.lane.b32.xlu0 %v1087_v32, %s2262_s14 }
 0x730   : > { %1426 = vrot.lane.b32.xlu0 %v1087_v32, %s2263_s15 }
 0x796   : > { %v1090_v3 = vpop.permute.xlu0 %1089  ;;  %v1203_v35 = vpop.permute.xlu1 %1202 }
 0x797   : > { %v1095_v34 = vsel %vm414_vm2, %v1090_v3, 0  ;;  %v1208_v36 = vsel %vm414_vm2, %v1203_v35, 0 }
 0x798   : > { %2015 = vmatpush3.bf16.xpose.msra.mxu0 %v1095_v34 }
 0x799   : > { %2026 = vmatprep.subr.bf16.mxu0 %v2255_v0 }
 0x79a   : > { %v1316_v37 = vpop.permute.xlu1 %1315  ;;  %v1201_v38 = vpop.permute.xlu0 %1200 }
 0x79b   : > { %v1321_v39 = vsel %vm414_vm2, %v1316_v37, 0 }
 0x79e   : > { %v1429_v40 = vpop.permute.xlu1 %1428  ;;  %v1314_v41 = vpop.permute.xlu0 %1313 }
 0x79f   : > { %2017 = vmatmul.mubr.msk.bf16.vlgmr.msra.gmra.mrb[24].mxu0 %vm414_vm2, %v1087_v32  ;;  %v1434_v42 = vsel %vm414_vm2, %v1429_v40, 0 }
 0x7a0   : > { %2027 = vmatpush3.bf16.xpose.msra.mxu0 %v1208_v36  ;;  %2028 = vmatprep.mubr.msk.bf16.mxu0 %vm2256_vm0, %v2255_v0 }
 0x7a1   : > { %2038 = vmatprep.subr.bf16.mxu0 %v2255_v0 }
 0x7a2   : > { %v1427_v43 = vpop.permute.xlu0 %1426 }
 0x7a7   : > { %2029 = vmatmul.mubr.msk.bf16.vlgmr.msra.gmra.mrb[28].mxu0 %vm414_vm2, %v1201_v38 }
 0x7a8   : > { %2039 = vmatpush3.bf16.xpose.msra.mxu0 %v1321_v39  ;;  %2040 = vmatprep.mubr.msk.bf16.mxu0 %vm2256_vm0, %v2255_v0 }
 0x7a9   : > { %2050 = vmatprep.subr.bf16.mxu0 %v2255_v0 }
 0x7af   : > { %2041 = vmatmul.mubr.msk.bf16.vlgmr.msra.gmra.mrb[32].mxu0 %vm414_vm2, %v1314_v41 }
 0x7b0   : > { %2051 = vmatpush3.bf16.xpose.msra.mxu0 %v1434_v42  ;;  %2052 = vmatprep.mubr.msk.bf16.mxu0 %vm2256_vm0, %v2255_v0 }
 0x7b1   : > { %2062 = vmatprep.subr.bf16.mxu0 %v2255_v0 }
 0x7b7   : > { %2053 = vmatmul.mubr.msk.bf16.vlgmr.msra.gmra.mrb[36].mxu0 %vm414_vm2, %v1427_v43 }
 0x7b8   : > { %2066 = vmatprep.mubr.msk.bf16.mxu0 %vm2256_vm0, %v2255_v0 }
 0x872   : > { %v1131_v44 = vpop.f32.mrb[24].mxu0 }
 0x873   : > { %v2018_v45 = vpop.f32.mrb[25].mxu0  ;;  %v1137_v46 = vsel %vm414_vm2, %v1131_v44, -inf }
 0x874   : > { %1138 = vmax.xlane.f32.xlu1 %v1137_v46  ;;  %v1134_v47 = vpop.f32.mrb[26].mxu0 }
 0x875   : > { %v2019_v48 = vpop.f32.mrb[27].mxu0 }
 0x87a   : > { %v1244_v49 = vpop.f32.mrb[28].mxu0 }
 0x87b   : > { %v2030_v50 = vpop.f32.mrb[29].mxu0  ;;  %v1250_v51 = vsel %vm414_vm2, %v1244_v49, -inf }
 0x87c   : > { %1251 = vmax.xlane.f32.xlu0 %v1250_v51  ;;  %v1247_v52 = vpop.f32.mrb[30].mxu0 }
 0x87d   : > { %v2031_v53 = vpop.f32.mrb[31].mxu0 }
 0x882   : > { %v1357_v54 = vpop.f32.mrb[32].mxu0 }
 0x883   : > { %v2042_v55 = vpop.f32.mrb[33].mxu0  ;;  %v1363_v56 = vsel %vm414_vm2, %v1357_v54, -inf }
 0x884   : > { %1364 = vmax.xlane.f32.xlu0 %v1363_v56  ;;  %v1360_v57 = vpop.f32.mrb[34].mxu0 }
 0x885   : > { %1264 = vrot.lane.b32.xlu1 %v1087_v32, %s2264_s30  ;;  %v2043_v58 = vpop.f32.mrb[35].mxu0 }
 0x886   : > { %v2142_v58 = vld [vmem:[#allocation2 + $0x18] sm:$0xff]  }
 0x88a   : > { %v1470_v59 = vpop.f32.mrb[36].mxu0 }
 0x88b   : > { %v2054_v60 = vpop.f32.mrb[37].mxu0  ;;  %v1476_v63 = vsel %vm414_vm2, %v1470_v59, -inf }
 0x88c   : > { %v1473_v61 = vpop.f32.mrb[38].mxu0 }
 0x88d   : > { %v2055_v62 = vpop.f32.mrb[39].mxu0 }
 0x89a   : > { %1151 = vrot.lane.b32.xlu0 %v1087_v32, %s2265_s16 }
 0x89e   : > { %1490 = vrot.lane.b32.xlu0 %v1087_v32, %s2266_s17 }
 0x8a9   : > { %1477 = vmax.xlane.f32.xlu1 %v1476_v63 }
 0x8ba   : > { %1377 = vrot.lane.b32.xlu1 %v1087_v32, %s2267_s11  ;;  %s330_s11 = scalar_lea.vmem %s2660_s8, %s1831_s9 }
 0x901   : > { %v1139_v1 = vpop.xlane.xlu1 %1138 }
 0x902   : > { %v1140_v5 = vsub.f32 %v1131_v44, %v1139_v1 }
 0x904   : > { %v1141_v6 = vmul.f32 1.442695, %v1140_v5 }
 0x905   : > { %v1265_v17 = vpop.permute.xlu1 %1264 }
 0x906   : > { %2163 = vpow2.f32 %v1141_v6  ;;  %v1270_v21 = vsel %vm480_vm3, %v1265_v17, 0 }
 0x909   : > { %v1252_v7 = vpop.xlane.xlu0 %1251 }
 0x90a   : > { %v1253_v8 = vsub.f32 %v1244_v49, %v1252_v7 }
 0x90c   : > { %v1254_v9 = vmul.f32 1.442695, %v1253_v8 }
 0x90e   : > { %2165 = vpow2.f32 %v1254_v9 }
 0x910   : > { %v2164_v13 = vpop.eup %2163 }
 0x911   : > { %v1365_v10 = vpop.xlane.xlu0 %1364  ;;  %v1150_v19 = vpack.c.bf16 %v2164_v13, %v2164_v13  ;;  %v1143_v22 = vsel %vm414_vm2, %v2164_v13, 0.0 }
 0x912   : > { %v1366_v11 = vsub.f32 %v1357_v54, %v1365_v10  ;;  %v2141_v54 = vld [vmem:[#allocation2 + $0x10] sm:$0xff]  }
 0x913   : > { %2063 = vmatpush3.bf16.msra.mxu0 %v2141_v54 }
 0x914   : > { %v1367_v12 = vmul.f32 1.442695, %v1366_v11  ;;  %2064 = vmatprep.subr.bf16.mxu0 %v2255_v0 }
 0x915   : > { %v1152_v14 = vpop.permute.xlu0 %1151 }
 0x916   : > { %2167 = vpow2.f32 %v1367_v12  ;;  %v1157_v15 = vsel %vm480_vm3, %v1152_v14, 0 }
 0x917   : > { %2021 = vmatpush3.bf16.msra.mxu1 %v1157_v15  ;;  %2065 = vmatpush3.bf16.msra.mxu0 %v2142_v58 }
 0x918   : > { %v2166_v18 = vpop.eup %2165  ;;  %2032 = vmatprep.subr.bf16.mxu1 %v2255_v0  ;;  %2078 = vmatprep.subr.bf16.mxu0 %v2255_v0 }
 0x919   : > { %v1256_v20 = vsel %vm414_vm2, %v2166_v18, 0.0  ;;  %v1263_v24 = vpack.c.bf16 %v2166_v18, %v2166_v18  ;;  %v1491_v32 = vpop.permute.xlu0 %1490 }
 0x91a   : > { %2023 = vmatmul.mubr.msk.bf16.vlgmr.msra.gmra.mrb[24].mxu1 %vm414_vm2, %v1150_v19  ;;  %1257 = vadd.xlane.f32.xlu1 %v1256_v20  ;;  %v1496_v3 = vsel %vm480_vm3, %v1491_v32, 0 }
 0x91b   : > { %2033 = vmatpush3.bf16.msra.mxu1 %v1270_v21  ;;  %2034 = vmatprep.mubr.msk.bf16.mxu1 %vm2256_vm0, %v2255_v0 }
 0x91c   : > { %2044 = vmatprep.subr.bf16.mxu1 %v2255_v0 }
 0x91e   : > { %1144 = vadd.xlane.f32.xlu1 %v1143_v22 }
 0x920   : > { %v2168_v23 = vpop.eup %2167 }
 0x921   : > { %v1369_v26 = vsel %vm414_vm2, %v2168_v23, 0.0  ;;  %v1376_v33 = vpack.c.bf16 %v2168_v23, %v2168_v23 }
 0x922   : > { %1370 = vadd.xlane.f32.xlu0 %v1369_v26  ;;  %2035 = vmatmul.mubr.msk.bf16.vlgmr.msra.gmra.mrb[28].mxu1 %vm414_vm2, %v1263_v24 }
 0x923   : > { %2046 = vmatprep.mubr.msk.bf16.mxu1 %vm2256_vm0, %v2255_v0 }
 0x936   : > { %v1478_v27 = vpop.xlane.xlu1 %1477 }
 0x937   : > { %v1479_v28 = vsub.f32 %v1470_v59, %v1478_v27 }
 0x939   : > { %v1480_v29 = vmul.f32 1.442695, %v1479_v28  ;;  %v2143_v28 = vld [vmem:[#allocation4 + $0x10] sm:$0xff]  }
 0x93a   : > { %v1378_v30 = vpop.permute.xlu1 %1377 }
 0x93b   : > { %2169 = vpow2.f32 %v1480_v29  ;;  %v1383_v31 = vsel %vm480_vm3, %v1378_v30, 0  ;;  %v2144_v29 = vld [vmem:[#allocation4 + $0x18] sm:$0xff]   ;;  %v1856_v30 = vld [vmem:[%s2656_s4 + $0x2] sm:$0x3] }
 0x93c   : > { %2045 = vmatpush3.bf16.msra.mxu1 %v1383_v31  ;;  %v1558_v31 = vrot.slane %v1856_v30, %v884_v4  ;;  %v2146_v4 = vld [vmem:[%s2658_s6 + $0x8] sm:$0xff]  }
 0x93d   : > { %2056 = vmatprep.subr.bf16.mxu1 %v2255_v0 }
 0x93f   : > { %2047 = vmatmul.mubr.msk.bf16.vlgmr.msra.gmra.mrb[32].mxu1 %vm414_vm2, %v1376_v33 }
 0x940   : > { %2057 = vmatpush3.bf16.msra.mxu1 %v1496_v3  ;;  %2058 = vmatprep.mubr.msk.bf16.mxu1 %vm2256_vm0, %v2255_v0 }
 0x941   : > { %2070 = vmatprep.subr.bf16.mxu1 %v2255_v0 }
 0x945   : > { %v2170_v34 = vpop.eup %2169 }
 0x946   : > { %v1482_v35 = vsel %vm414_vm2, %v2170_v34, 0.0  ;;  %v1489_v36 = vpack.c.bf16 %v2170_v34, %v2170_v34 }
 0x947   : > { %1483 = vadd.xlane.f32.xlu0 %v1482_v35 }
 0x948   : > { %2059 = vmatmul.mubr.msk.bf16.vlgmr.msra.gmra.mrb[36].mxu1 %vm414_vm2, %v1489_v36 }
 0x949   : > { %2074 = vmatprep.mubr.msk.bf16.mxu1 %vm2256_vm0, %v2255_v0  ;;  %2071 = vmatpush3.bf16.msra.mxu1 %v2143_v28 }
 0x94a   : > { %2072 = vmatprep.subr.bf16.mxu1 %v2255_v0 }
 0x94d   : > { %2073 = vmatpush3.bf16.msra.mxu1 %v2144_v29 }
 0x9a7   : > { %v1258_v37 = vpop.xlane.xlu1 %1257 }
 0x9a8   : > { %2171 = vrcp.f32 %v1258_v37 }
 0x9ab   : > { %v1145_v13 = vpop.xlane.xlu1 %1144 }
 0x9af   : > { %v1371_v51 = vpop.xlane.xlu0 %1370 }
 0x9b0   : > { %2173 = vrcp.f32 %v1371_v51 }
 0x9b2   : > { %v2172_v38 = vpop.eup %2171 }
 0x9b3   : > { %v1260_v39 = vmul.f32 %v2172_v38, %v1258_v37 }
 0x9b5   : > { %v1261_v43 = vsub.f32 2.0, %v1260_v39  ;;  %v1619_v39 = vrot.slane %v1856_v30, %v945_v16 }
 0x9b7   : > { %v1262_v45 = vmul.f32 %v2172_v38, %v1261_v43  ;;  %v2145_v38 = vld [vmem:[%s2658_s6] sm:$0xff]  }
 0x9ba   : > { %v2174_v53 = vpop.eup %2173 }
 0x9bb   : > { %v1373_v55 = vmul.f32 %v2174_v53, %v1371_v51 }
 0x9bd   : > { %v1374_v56 = vsub.f32 2.0, %v1373_v55 }
 0x9bf   : > { %v1375_v59 = vmul.f32 %v2174_v53, %v1374_v56 }
 0x9d4   : > { %v1484_v52 = vpop.xlane.xlu0 %1483 }
 0x9d5   : > { %2175 = vrcp.f32 %v1484_v52 }
 0x9d6   : > { %2177 = vrcp.f32 %v1145_v13 }
 0x9df   : > { %v2176_v57 = vpop.eup %2175 }
 0x9e0   : > { %v1486_v60 = vmul.f32 %v2176_v57, %v1484_v52  ;;  %v2178_v14 = vpop.eup %2177 }
 0x9e1   : > { %v1147_v15 = vmul.f32 %v2178_v14, %v1145_v13 }
 0x9e2   : > { %v1487_v6 = vsub.f32 2.0, %v1486_v60 }
 0x9e3   : > { %v1148_v17 = vsub.f32 2.0, %v1147_v15 }
 0x9e4   : > { %v1488_v7 = vmul.f32 %v2176_v57, %v1487_v6 }
 0x9e5   : > { %v1149_v18 = vmul.f32 %v2178_v14, %v1148_v17 }
 0x9ed   : > { %v1193_v40 = vpop.f32.mrb[24].mxu1 }
 0x9ee   : > { %v2024_v41 = vpop.f32.mrb[25].mxu1  ;;  %v1199_v21 = vmul.f32 %v1193_v40, %v1149_v18 }
 0x9ef   : > { %v1196_v42 = vpop.f32.mrb[26].mxu1 }
 0x9f0   : > { %v2025_v44 = vpop.f32.mrb[27].mxu1 }
 0x9f5   : > { %v1306_v46 = vpop.f32.mrb[28].mxu1 }
 0x9f6   : > { %v1312_v47 = vmul.f32 %v1306_v46, %v1262_v45  ;;  %v2036_v48 = vpop.f32.mrb[29].mxu1 }
 0x9f7   : > { %v1309_v49 = vpop.f32.mrb[30].mxu1  ;;  %v1875_v48 = vld [vmem:[%s2659_s7] ss:$0 sm:$0xff] }
 0x9f8   : > { %v2037_v50 = vpop.f32.mrb[31].mxu1  ;;  %1540 = vrot.lane.b32.xlu0 %v1312_v47, %s2268_s12 }
 0xa12   : > { %v1419_v61 = vpop.f32.mrb[32].mxu1 }
 0xa13   : > { %v1425_v62 = vmul.f32 %v1419_v61, %v1375_v59  ;;  %v2048_v63 = vpop.f32.mrb[33].mxu1 }
 0xa14   : > { %v1422_v1 = vpop.f32.mrb[34].mxu1 }
 0xa15   : > { %1544 = vrot.lane.b32.xlu1 %v1425_v62, %s2269_s18  ;;  %v2049_v5 = vpop.f32.mrb[35].mxu1 }
 0xa1b   : > { %v1532_v8 = vpop.f32.mrb[36].mxu1 }
 0xa1c   : > { %v1538_v9 = vmul.f32 %v1532_v8, %v1488_v7  ;;  %v2060_v10 = vpop.f32.mrb[37].mxu1 }
 0xa1d   : > { %v1535_v11 = vpop.f32.mrb[38].mxu1 }
 0xa1e   : > { %1548 = vrot.lane.b32.xlu1 %v1538_v9, %s2270_s19  ;;  %v2061_v12 = vpop.f32.mrb[39].mxu1 }
 0xa6a   : > { %v1541_v19 = vpop.permute.xlu0 %1540 }
 0xa6b   : > { %v1551_v22 = vsel %vm414_vm2, %v1199_v21, %v1541_v19 }
 0xa87   : > { %v1545_v20 = vpop.permute.xlu1 %1544 }
 0xa88   : > { %v1552_v23 = vsel %vm877_vm4, %v1551_v22, %v1545_v20 }
 0xa90   : > { %v1549_v24 = vpop.permute.xlu1 %1548 }
 0xa91   : > { %v1553_v26 = vsel %vm879_vm5, %v1552_v23, %v1549_v24 }
 0xa92   : > { %v1554_v27 = vpack.c.bf16 %v1553_v26, %v1553_v26 }
 0xa94   : > { %2067 = vmatmul.mubr.msk.bf16.vlgmr.msra.gmra.mrb[40].mxu0 %vm366_vm1, %v1554_v27 }
 0xa95   : > { %2082 = vmatprep.mubr.msk.bf16.mxu0 %vm2256_vm0, %v2255_v0  ;;  %2079 = vmatpush3.bf16.msra.mxu0 %v2145_v38 }
 0xa96   : > { %2080 = vmatprep.subr.bf16.mxu0 %v2255_v0 }
 0xa99   : > { %2081 = vmatpush3.bf16.msra.mxu0 %v2146_v4 }
 0xb67   : > { %v1608_v32 = vpop.f32.mrb[40].mxu0 }
 0xb68   : > { %v1609_v33 = vadd.f32 %v1608_v32, %v1558_v31  ;;  %v2068_v3 = vpop.f32.mrb[41].mxu0 }
 0xb69   : > { %v1611_v34 = vpop.f32.mrb[42].mxu0 }
 0xb6a   : > { %v1614_v35 = vsub.f32 %v2542_v25, %v1609_v33  ;;  %v2069_v36 = vpop.f32.mrb[43].mxu0 }
 0xb6c   : > { %v1615_v37 = vpack.c.bf16 %v1614_v35, %v1614_v35 }
 0xb6e   : > { %2075 = vmatmul.mubr.msk.bf16.vlgmr.msra.gmra.mrb[40].mxu1 %vm366_vm1, %v1615_v37 }
 0xc41   : > { %v1669_v40 = vpop.f32.mrb[40].mxu1 }
 0xc42   : > { %v1670_v41 = vadd.f32 %v1669_v40, %v1619_v39  ;;  %v2076_v42 = vpop.f32.mrb[41].mxu1 }
 0xc43   : > { %v1672_v43 = vpop.f32.mrb[42].mxu1 }
 0xc44   : > { %vm1675_vm7 = vcmp.ge.f32.partialorder %v1670_v41, 0.0  ;;  %v1676_v44 = vmul.f32 0.2, %v1670_v41  ;;  %v2077_v45 = vpop.f32.mrb[43].mxu1 }
 0xc46   : > { %v1677_v46 = vsel %vm1675_vm7, %v1670_v41, %v1676_v44 }
 0xc47   : > { %v1678_v47 = vadd.f32 %v1677_v46, %v2542_v25 }
 0xc49   : > { %v1679_v0 = vpack.c.bf16 %v1678_v47, %v1678_v47 }
 0xc4b   : > { %2083 = vmatmul.mubr.msk.bf16.vlgmr.msra.gmra.mrb[44].mxu0 %vm366_vm1, %v1679_v0 }
 0xd1e   : > { %v1740_v2 = vpop.f32.mrb[44].mxu0 }
 0xd1f   : > { %v1741_v16 = vadd.f32 %v1875_v48, %v1740_v2  ;;  %v2084_v49 = vpop.f32.mrb[45].mxu0 }
 0xd20   : > { %v1743_v50 = vpop.f32.mrb[46].mxu0 }
 0xd21   : > { %1746 = vst [vmem:[%s330_s11] sm:$0xff] %v1741_v16  ;;  %v2085_v51 = vpop.f32.mrb[47].mxu0 }
 0xd22 PF: > { %s20_s27 = sadd.s32 1, %s2249_s27  }
 0xd23   : > { %p17_p5 = scmp.ge.s32.totalorder %s20_s27, 4  }
 0xd25   :  { %19 = sbr.rel (!%p17_p5) target bundleno = 2 (0x2), region = 96 }
 0xd2c   :  { %1766 = vsyncpa [#allocation3], 1 }
 0xd2d   :  { %1768 = vsyncpa [#allocation3 + $0x1], 1 }
 0xd2e   :  { %1769 = vsyncpa [#allocation5], 1 }

</bundles_post_ra>
